<compile_context>
chip_gen: v6e
topology: v6e:2x2x1
jax: 0.10.0
libtpu: 0.0.40
codegen_flags: <defaults>
</compile_context>

<pallas_src>
import functools

import jax
import jax.numpy as jnp
from jax.experimental import pallas as pl
from jax.experimental.pallas import tpu as pltpu

K = 3        # kernel_size
P = 1        # padding_size
LANES = 128  # TPU lane width; OUTPUT channels are padded to a multiple of this.


def _round_up(x, m):
    return (x + m - 1) // m * m


def _conv3d_bn_relu_kernel(x0_ref, x1_ref, x2_ref, w_ref, sb_ref, o_ref, *,
                           H, W, Cin, Cout):
    """One (n, d) grid step of Conv3d(k=3, s=1, p=1) + scale/shift + ReLU.

    x{0,1,2}_ref : (1, 1, H+2P, W+2P, Cin)  padded input depth slices d, d+1, d+2
    w_ref        : (K*K*K, Cin, Cout)       per-tap weights, tap = kd*9 + kh*3 + kw
    sb_ref       : (2, Cout)                row 0 = scale, row 1 = shift (f32)
    o_ref        : (1, 1, H, W, Cout)       output depth slice d
    """
    acc = None  # f32 register accumulator; first tap stores directly (no zero-init).
    for kd, x_ref in enumerate((x0_ref, x1_ref, x2_ref)):
        x = x_ref[0, 0, :, :, :]                            # (H+2P, W+2P, Cin)
        for kh in range(K):
            for kw in range(K):
                # Shifted window for this tap; one small MXU dot per tap.
                tap = x[kh:kh + H, kw:kw + W, :].reshape(H * W, Cin)
                contrib = jnp.dot(tap, w_ref[kd * K * K + kh * K + kw],
                                  preferred_element_type=jnp.float32)
                acc = contrib if acc is None else acc + contrib

    scale = sb_ref[pl.ds(0, 1), :]                          # (1, Cout) f32
    shift = sb_ref[pl.ds(1, 1), :]
    y = jnp.maximum(acc * scale + shift, 0.0)
    o_ref[...] = y.reshape(1, 1, H, W, Cout).astype(o_ref.dtype)


def conv3d_bn_relu(x_ndhwc, w_taps, scale, shift, *, out_dtype=None):
    """Fused Conv3d(k=3, s=1, p=1) + per-channel affine (bias/BN) + ReLU.

    x_ndhwc : (N, D, H, W, Cin_p)  channels already padded (pack or lane multiple)
    w_taps  : (K*K*K, Cin_p, Cout_p)
    scale, shift : (Cout_p,) float32
    """
    N, D, H, W, Cin = x_ndhwc.shape
    assert w_taps.shape[0] == K * K * K and w_taps.shape[1] == Cin, w_taps.shape
    Cout = w_taps.shape[-1]
    out_dtype = jnp.dtype(out_dtype if out_dtype is not None else x_ndhwc.dtype)

    # Spatial halo (D/H/W zero-pad by P).  TODO(synk): fold into the kernel.
    xp = jnp.pad(x_ndhwc, ((0, 0), (P, P), (P, P), (P, P), (0, 0)))
    sb = jnp.stack([scale, shift], axis=0).astype(jnp.float32)

    kernel = functools.partial(
        _conv3d_bn_relu_kernel, H=H, W=W, Cin=Cin, Cout=Cout)

    in_itm = xp.dtype.itemsize
    out_itm = out_dtype.itemsize
    slab_in = (H + 2 * P) * (W + 2 * P) * Cin * in_itm
    # VMEM budget: 3 double-buffered depth slices + double-buffered output +
    # resident weights/scale-shift + f32 accumulator + tap-slice temporaries.
    vmem_bytes = int(
        3 * 2 * slab_in
        + 2 * H * W * Cout * out_itm
        + 2 * w_taps.size * w_taps.dtype.itemsize
        + 2 * sb.size * 4
        + H * W * Cout * 4
        + 2 * H * W * Cin * in_itm
    )
    # Clamp to the chip's physical VMEM (v7x: 64 MiB/TC).
    try:
        vmem_cap = int(pltpu.get_tpu_info().vmem_capacity_bytes)
    except Exception:  # pragma: no cover - conservative fallback
        vmem_cap = 64 << 20
    vmem_limit = int(min(max(int(1.25 * vmem_bytes), 32 << 20),
                         vmem_cap - (4 << 20)))

    cost = pl.CostEstimate(
        flops=int(2 * N * D * H * W * K * K * K * Cin * Cout),
        transcendentals=0,
        bytes_accessed=int(
            3 * N * D * slab_in
            + w_taps.size * w_taps.dtype.itemsize
            + N * D * H * W * Cout * out_itm),
    )

    in_specs = [
        # Three depth taps of the SAME padded array (kd reduction is in-kernel).
        pl.BlockSpec((1, 1, H + 2 * P, W + 2 * P, Cin),
                     lambda n, d: (n, d, 0, 0, 0)),
        pl.BlockSpec((1, 1, H + 2 * P, W + 2 * P, Cin),
                     lambda n, d: (n, d + 1, 0, 0, 0)),
        pl.BlockSpec((1, 1, H + 2 * P, W + 2 * P, Cin),
                     lambda n, d: (n, d + 2, 0, 0, 0)),
        # Weights / scale+shift: constant index map -> fetched once, resident.
        pl.BlockSpec(w_taps.shape, lambda n, d: (0, 0, 0)),
        pl.BlockSpec(sb.shape, lambda n, d: (0, 0)),
    ]

    return pl.pallas_call(
        kernel,
        out_shape=jax.ShapeDtypeStruct((N, D, H, W, Cout), out_dtype),
        grid_spec=pltpu.PrefetchScalarGridSpec(
            num_scalar_prefetch=0,
            grid=(N, D),
            in_specs=in_specs,
            out_specs=pl.BlockSpec((1, 1, H, W, Cout),
                                   lambda n, d: (n, d, 0, 0, 0)),
        ),
        compiler_params=pltpu.CompilerParams(
            # No cross-step accumulation any more -> both axes are parallel
            # (shardable across TensorCores on v7x megacore).
            dimension_semantics=("parallel", "parallel"),
            vmem_limit_bytes=vmem_limit,
        ),
        cost_estimate=cost,
    )(xp, xp, xp, w_taps, sb)


def _fold_bn(bias, gamma, beta, mean, var, eps=1e-5):
    scale = gamma / jnp.sqrt(var + eps)
    shift = (bias - mean) * scale + beta
    return scale, shift


def _torch_weight_to_taps(w_oidhw, cin_p, cout_p):
    # (Cout, Cin, kd, kh, kw) -> (kd, kh, kw, Cin, Cout), zero-pad channels,
    # flatten the 27 taps into the leading axis: (K*K*K, Cin_p, Cout_p).
    Cout, Cin = w_oidhw.shape[0], w_oidhw.shape[1]
    w = jnp.transpose(w_oidhw, (2, 3, 4, 1, 0))
    w = jnp.pad(w, ((0, 0), (0, 0), (0, 0), (0, cin_p - Cin), (0, cout_p - Cout)))
    return w.reshape(K * K * K, cin_p, cout_p)


def init_unet_conv3_params(key, inplanes, outplanes, is_batchnorm=True):
    ks = jax.random.split(key, 10)
    p = {"is_batchnorm": is_batchnorm}
    # conv1: Conv3d(inplanes, outplanes, 3, stride=1, padding=1)
    p["w1"] = 0.1 * jax.random.normal(ks[0], (outplanes, inplanes, K, K, K), jnp.float32)
    p["b1"] = 0.1 * jax.random.normal(ks[1], (outplanes,), jnp.float32)
    # conv2: Conv3d(outplanes, outplanes, 3, stride=1, padding=1)
    p["w2"] = 0.1 * jax.random.normal(ks[2], (outplanes, outplanes, K, K, K), jnp.float32)
    p["b2"] = 0.1 * jax.random.normal(ks[3], (outplanes,), jnp.float32)
    if is_batchnorm:
        p["g1"] = 1.0 + 0.1 * jax.random.normal(ks[4], (outplanes,), jnp.float32)
        p["be1"] = 0.1 * jax.random.normal(ks[5], (outplanes,), jnp.float32)
        p["m1"] = 0.05 * jax.random.normal(ks[6], (outplanes,), jnp.float32)
        p["v1"] = 0.9 + 0.1 * jax.random.uniform(ks[7], (outplanes,), jnp.float32)
        p["g2"] = 1.0 + 0.1 * jax.random.normal(ks[8], (outplanes,), jnp.float32)
        p["be2"] = 0.1 * jax.random.normal(ks[9], (outplanes,), jnp.float32)
        p["m2"] = jnp.zeros((outplanes,), jnp.float32)
        p["v2"] = jnp.ones((outplanes,), jnp.float32)
    return p


def unet_conv3_forward(x_ncdhw, p, *, compute_dtype=None):
    """Forward pass matching UnetConv3: conv1 block then conv2 block.

    compute_dtype: dtype fed to the MXU (jnp.bfloat16 recommended on v6e/v7x);
    accumulation and the scale/shift/ReLU epilogue stay f32.
    """
    N, Cin, D, H, W = x_ncdhw.shape
    compute_dtype = jnp.dtype(
        compute_dtype if compute_dtype is not None else x_ncdhw.dtype)
    Cout = p["w1"].shape[0]

    # Small-Cin first layer: pad input channels only to the dtype pack (8 f32 /
    # 16 bf16) instead of 128 lanes -> no ~32x inflation of layer-1 MXU work
    # and input DMA bytes.  Output channels stay lane-padded for lane-dense
    # stores, so conv2's input channels are already a multiple of 128.
    pack = 8 * max(1, 4 // compute_dtype.itemsize)
    cin_p = _round_up(Cin, LANES) if Cin >= LANES else _round_up(Cin, pack)
    cout_p = _round_up(Cout, LANES)

    if p["is_batchnorm"]:
        s1, sh1 = _fold_bn(p["b1"], p["g1"], p["be1"], p["m1"], p["v1"])
        s2, sh2 = _fold_bn(p["b2"], p["g2"], p["be2"], p["m2"], p["v2"])
    else:
        s1, sh1 = jnp.ones_like(p["b1"]), p["b1"]
        s2, sh2 = jnp.ones_like(p["b2"]), p["b2"]

    padc = lambda v: jnp.pad(v, (0, cout_p - Cout)).astype(jnp.float32)
    s1, sh1, s2, sh2 = padc(s1), padc(sh1), padc(s2), padc(sh2)

    # NCDHW -> NDHWC + channel pad (single fused copy).
    x = jnp.transpose(x_ncdhw, (0, 2, 3, 4, 1))
    x = jnp.pad(x, ((0, 0),) * 4 + ((0, cin_p - Cin),)).astype(compute_dtype)

    w1 = _torch_weight_to_taps(p["w1"], cin_p, cout_p).astype(compute_dtype)
    w2 = _torch_weight_to_taps(p["w2"], cout_p, cout_p).astype(compute_dtype)

    y = conv3d_bn_relu(x, w1, s1, sh1, out_dtype=compute_dtype)
    y = conv3d_bn_relu(y, w2, s2, sh2, out_dtype=x_ncdhw.dtype)

    y = y[..., :Cout]                              # drop channel padding
    return jnp.transpose(y, (0, 4, 1, 2, 3))       # NDHWC -> NCDHW


def _reference_forward(x_ncdhw, p):
    """Plain-JAX reference (lax conv) for correctness checking."""
    def block(x, w_oidhw, scale, shift):
        w = jnp.transpose(w_oidhw, (2, 3, 4, 1, 0))  # DHWIO
        y = jax.lax.conv_general_dilated(
            x, w, window_strides=(1, 1, 1), padding=[(P, P)] * 3,
            dimension_numbers=("NDHWC", "DHWIO", "NDHWC"))
        return jnp.maximum(y * scale + shift, 0.0)

    x = jnp.transpose(x_ncdhw, (0, 2, 3, 4, 1))
    if p["is_batchnorm"]:
        s1, sh1 = _fold_bn(p["b1"], p["g1"], p["be1"], p["m1"], p["v1"])
        s2, sh2 = _fold_bn(p["b2"], p["g2"], p["be2"], p["m2"], p["v2"])
    else:
        s1, sh1 = jnp.ones_like(p["b1"]), p["b1"]
        s2, sh2 = jnp.ones_like(p["b2"]), p["b2"]
    y = block(x, p["w1"], s1, sh1)
    y = block(y, p["w2"], s2, sh2)
    return jnp.transpose(y, (0, 4, 1, 2, 3))


if __name__ == "__main__":
    key = jax.random.PRNGKey(0)
    k_x, k_p = jax.random.split(key)

    N, Cin, Cout, D, H, W = 2, 4, 8, 8, 8, 8
    x = jax.random.normal(k_x, (N, Cin, D, H, W), jnp.float32)  # PyTorch NCDHW
    params = init_unet_conv3_params(k_p, Cin, Cout, is_batchnorm=True)

    ref = jax.block_until_ready(_reference_forward(x, params))

    # f32 path: tight match against the lax.conv reference.
    out = jax.block_until_ready(unet_conv3_forward(x, params))
    assert out.shape == (N, Cout, D, H, W), out.shape
    assert jnp.allclose(out, ref, atol=1e-3, rtol=1e-3), float(
        jnp.max(jnp.abs(out - ref)))

    # bf16 MXU path (recommended on v6e/v7x): f32 accumulation + f32 epilogue.
    out_bf16 = jax.block_until_ready(
        unet_conv3_forward(x, params, compute_dtype=jnp.bfloat16))
    assert out_bf16.shape == (N, Cout, D, H, W), out_bf16.shape
    assert jnp.allclose(out_bf16, ref, atol=2e-1, rtol=1e-1), float(
        jnp.max(jnp.abs(out_bf16 - ref)))

    print("KERNEL_OK")
</pallas_src>

<mosaic_0001>
module attributes {stable_mosaic.version = 11 : i64} {
  func.func @_conv3d_bn_relu_kernel(%arg0: i32, %arg1: i32, %arg2: memref<1x1x10x10x8xf32, #tpu.memory_space<vmem>>, %arg3: memref<1x1x10x10x8xf32, #tpu.memory_space<vmem>>, %arg4: memref<1x1x10x10x8xf32, #tpu.memory_space<vmem>>, %arg5: memref<27x8x128xf32, #tpu.memory_space<vmem>>, %arg6: memref<2x128xf32, #tpu.memory_space<vmem>>, %arg7: memref<1x1x8x8x128xf32, #tpu.memory_space<vmem>>) attributes {dimension_semantics = [#tpu.dimension_semantics<parallel>, #tpu.dimension_semantics<parallel>], iteration_bounds = array<i64: 2, 8>, scalar_prefetch = 0 : i64, scratch_operands = 0 : i64, tpu.core_type = #tpu.core_type<tc>, window_params = [{transform_indices = @transform_0, window_bounds = array<i64: 1, 1, 10, 10, 8>}, {transform_indices = @transform_1, window_bounds = array<i64: 1, 1, 10, 10, 8>}, {transform_indices = @transform_2, window_bounds = array<i64: 1, 1, 10, 10, 8>}, {pipeline_mode = #tpu.pipeline_mode<synchronous>, transform_indices = @transform_3, window_bounds = array<i64: 27, 8, 128>}, {pipeline_mode = #tpu.pipeline_mode<synchronous>, transform_indices = @transform_4, window_bounds = array<i64: 2, 128>}, {transform_indices = @transform_5, window_bounds = array<i64: 1, 1, 8, 8, 128>}]} {
    %c0 = arith.constant 0 : index
    %c0_0 = arith.constant 0 : index
    %c0_1 = arith.constant 0 : index
    %c0_2 = arith.constant 0 : index
    %c0_3 = arith.constant 0 : index
    %0 = vector.load %arg2[%c0, %c0_0, %c0_1, %c0_2, %c0_3] : memref<1x1x10x10x8xf32, #tpu.memory_space<vmem>>, vector<1x1x10x10x8xf32>
    %1 = vector.shape_cast %0 : vector<1x1x10x10x8xf32> to vector<10x10x8xf32>
    %2 = vector.extract_strided_slice %1 {offsets = [0, 0, 0], sizes = [8, 8, 8], strides = [1, 1, 1]} : vector<10x10x8xf32> to vector<8x8x8xf32>
    %3 = vector.shape_cast %2 : vector<8x8x8xf32> to vector<64x8xf32>
    %c0_4 = arith.constant 0 : index
    %c0_5 = arith.constant 0 : index
    %c0_6 = arith.constant 0 : index
    %4 = vector.load %arg5[%c0_4, %c0_5, %c0_6] : memref<27x8x128xf32, #tpu.memory_space<vmem>>, vector<1x8x128xf32>
    %5 = vector.shape_cast %4 : vector<1x8x128xf32> to vector<8x128xf32>
    %cst = arith.constant dense<0.000000e+00> : vector<64x128xf32>
    %6 = tpu.matmul %3, %5, %cst {dimension_numbers = #tpu.dot_dimension_numbers<[1], [0], [0], [1], [0, 0, 1, 1], [], []>} : vector<64x8xf32>, vector<8x128xf32>, vector<64x128xf32> -> vector<64x128xf32>
    %7 = vector.extract_strided_slice %1 {offsets = [0, 1, 0], sizes = [8, 8, 8], strides = [1, 1, 1]} : vector<10x10x8xf32> to vector<8x8x8xf32>
    %8 = vector.shape_cast %7 : vector<8x8x8xf32> to vector<64x8xf32>
    %c1 = arith.constant 1 : index
    %c0_7 = arith.constant 0 : index
    %c0_8 = arith.constant 0 : index
    %9 = vector.load %arg5[%c1, %c0_7, %c0_8] : memref<27x8x128xf32, #tpu.memory_space<vmem>>, vector<1x8x128xf32>
    %10 = vector.shape_cast %9 : vector<1x8x128xf32> to vector<8x128xf32>
    %cst_9 = arith.constant dense<0.000000e+00> : vector<64x128xf32>
    %11 = tpu.matmul %8, %10, %cst_9 {dimension_numbers = #tpu.dot_dimension_numbers<[1], [0], [0], [1], [0, 0, 1, 1], [], []>} : vector<64x8xf32>, vector<8x128xf32>, vector<64x128xf32> -> vector<64x128xf32>
    %12 = arith.addf %6, %11 : vector<64x128xf32>
    %13 = vector.extract_strided_slice %1 {offsets = [0, 2, 0], sizes = [8, 8, 8], strides = [1, 1, 1]} : vector<10x10x8xf32> to vector<8x8x8xf32>
    %14 = vector.shape_cast %13 : vector<8x8x8xf32> to vector<64x8xf32>
    %c2 = arith.constant 2 : index
    %c0_10 = arith.constant 0 : index
    %c0_11 = arith.constant 0 : index
    %15 = vector.load %arg5[%c2, %c0_10, %c0_11] : memref<27x8x128xf32, #tpu.memory_space<vmem>>, vector<1x8x128xf32>
    %16 = vector.shape_cast %15 : vector<1x8x128xf32> to vector<8x128xf32>
    %cst_12 = arith.constant dense<0.000000e+00> : vector<64x128xf32>
    %17 = tpu.matmul %14, %16, %cst_12 {dimension_numbers = #tpu.dot_dimension_numbers<[1], [0], [0], [1], [0, 0, 1, 1], [], []>} : vector<64x8xf32>, vector<8x128xf32>, vector<64x128xf32> -> vector<64x128xf32>
    %18 = arith.addf %12, %17 : vector<64x128xf32>
    %19 = vector.extract_strided_slice %1 {offsets = [1, 0, 0], sizes = [8, 8, 8], strides = [1, 1, 1]} : vector<10x10x8xf32> to vector<8x8x8xf32>
    %20 = vector.shape_cast %19 : vector<8x8x8xf32> to vector<64x8xf32>
    %c3 = arith.constant 3 : index
    %c0_13 = arith.constant 0 : index
    %c0_14 = arith.constant 0 : index
    %21 = vector.load %arg5[%c3, %c0_13, %c0_14] : memref<27x8x128xf32, #tpu.memory_space<vmem>>, vector<1x8x128xf32>
    %22 = vector.shape_cast %21 : vector<1x8x128xf32> to vector<8x128xf32>
    %cst_15 = arith.constant dense<0.000000e+00> : vector<64x128xf32>
    %23 = tpu.matmul %20, %22, %cst_15 {dimension_numbers = #tpu.dot_dimension_numbers<[1], [0], [0], [1], [0, 0, 1, 1], [], []>} : vector<64x8xf32>, vector<8x128xf32>, vector<64x128xf32> -> vector<64x128xf32>
    %24 = arith.addf %18, %23 : vector<64x128xf32>
    %25 = vector.extract_strided_slice %1 {offsets = [1, 1, 0], sizes = [8, 8, 8], strides = [1, 1, 1]} : vector<10x10x8xf32> to vector<8x8x8xf32>
    %26 = vector.shape_cast %25 : vector<8x8x8xf32> to vector<64x8xf32>
    %c4 = arith.constant 4 : index
    %c0_16 = arith.constant 0 : index
    %c0_17 = arith.constant 0 : index
    %27 = vector.load %arg5[%c4, %c0_16, %c0_17] : memref<27x8x128xf32, #tpu.memory_space<vmem>>, vector<1x8x128xf32>
    %28 = vector.shape_cast %27 : vector<1x8x128xf32> to vector<8x128xf32>
    %cst_18 = arith.constant dense<0.000000e+00> : vector<64x128xf32>
    %29 = tpu.matmul %26, %28, %cst_18 {dimension_numbers = #tpu.dot_dimension_numbers<[1], [0], [0], [1], [0, 0, 1, 1], [], []>} : vector<64x8xf32>, vector<8x128xf32>, vector<64x128xf32> -> vector<64x128xf32>
    %30 = arith.addf %24, %29 : vector<64x128xf32>
    %31 = vector.extract_strided_slice %1 {offsets = [1, 2, 0], sizes = [8, 8, 8], strides = [1, 1, 1]} : vector<10x10x8xf32> to vector<8x8x8xf32>
    %32 = vector.shape_cast %31 : vector<8x8x8xf32> to vector<64x8xf32>
    %c5 = arith.constant 5 : index
    %c0_19 = arith.constant 0 : index
    %c0_20 = arith.constant 0 : index
    %33 = vector.load %arg5[%c5, %c0_19, %c0_20] : memref<27x8x128xf32, #tpu.memory_space<vmem>>, vector<1x8x128xf32>
    %34 = vector.shape_cast %33 : vector<1x8x128xf32> to vector<8x128xf32>
    %cst_21 = arith.constant dense<0.000000e+00> : vector<64x128xf32>
    %35 = tpu.matmul %32, %34, %cst_21 {dimension_numbers = #tpu.dot_dimension_numbers<[1], [0], [0], [1], [0, 0, 1, 1], [], []>} : vector<64x8xf32>, vector<8x128xf32>, vector<64x128xf32> -> vector<64x128xf32>
    %36 = arith.addf %30, %35 : vector<64x128xf32>
    %37 = vector.extract_strided_slice %1 {offsets = [2, 0, 0], sizes = [8, 8, 8], strides = [1, 1, 1]} : vector<10x10x8xf32> to vector<8x8x8xf32>
    %38 = vector.shape_cast %37 : vector<8x8x8xf32> to vector<64x8xf32>
    %c6 = arith.constant 6 : index
    %c0_22 = arith.constant 0 : index
    %c0_23 = arith.constant 0 : index
    %39 = vector.load %arg5[%c6, %c0_22, %c0_23] : memref<27x8x128xf32, #tpu.memory_space<vmem>>, vector<1x8x128xf32>
    %40 = vector.shape_cast %39 : vector<1x8x128xf32> to vector<8x128xf32>
    %cst_24 = arith.constant dense<0.000000e+00> : vector<64x128xf32>
    %41 = tpu.matmul %38, %40, %cst_24 {dimension_numbers = #tpu.dot_dimension_numbers<[1], [0], [0], [1], [0, 0, 1, 1], [], []>} : vector<64x8xf32>, vector<8x128xf32>, vector<64x128xf32> -> vector<64x128xf32>
    %42 = arith.addf %36, %41 : vector<64x128xf32>
    %43 = vector.extract_strided_slice %1 {offsets = [2, 1, 0], sizes = [8, 8, 8], strides = [1, 1, 1]} : vector<10x10x8xf32> to vector<8x8x8xf32>
    %44 = vector.shape_cast %43 : vector<8x8x8xf32> to vector<64x8xf32>
    %c7 = arith.constant 7 : index
    %c0_25 = arith.constant 0 : index
    %c0_26 = arith.constant 0 : index
    %45 = vector.load %arg5[%c7, %c0_25, %c0_26] : memref<27x8x128xf32, #tpu.memory_space<vmem>>, vector<1x8x128xf32>
    %46 = vector.shape_cast %45 : vector<1x8x128xf32> to vector<8x128xf32>
    %cst_27 = arith.constant dense<0.000000e+00> : vector<64x128xf32>
    %47 = tpu.matmul %44, %46, %cst_27 {dimension_numbers = #tpu.dot_dimension_numbers<[1], [0], [0], [1], [0, 0, 1, 1], [], []>} : vector<64x8xf32>, vector<8x128xf32>, vector<64x128xf32> -> vector<64x128xf32>
    %48 = arith.addf %42, %47 : vector<64x128xf32>
    %49 = vector.extract_strided_slice %1 {offsets = [2, 2, 0], sizes = [8, 8, 8], strides = [1, 1, 1]} : vector<10x10x8xf32> to vector<8x8x8xf32>
    %50 = vector.shape_cast %49 : vector<8x8x8xf32> to vector<64x8xf32>
    %c8 = arith.constant 8 : index
    %c0_28 = arith.constant 0 : index
    %c0_29 = arith.constant 0 : index
    %51 = vector.load %arg5[%c8, %c0_28, %c0_29] : memref<27x8x128xf32, #tpu.memory_space<vmem>>, vector<1x8x128xf32>
    %52 = vector.shape_cast %51 : vector<1x8x128xf32> to vector<8x128xf32>
    %cst_30 = arith.constant dense<0.000000e+00> : vector<64x128xf32>
    %53 = tpu.matmul %50, %52, %cst_30 {dimension_numbers = #tpu.dot_dimension_numbers<[1], [0], [0], [1], [0, 0, 1, 1], [], []>} : vector<64x8xf32>, vector<8x128xf32>, vector<64x128xf32> -> vector<64x128xf32>
    %54 = arith.addf %48, %53 : vector<64x128xf32>
    %c0_31 = arith.constant 0 : index
    %c0_32 = arith.constant 0 : index
    %c0_33 = arith.constant 0 : index
    %c0_34 = arith.constant 0 : index
    %c0_35 = arith.constant 0 : index
    %55 = vector.load %arg3[%c0_31, %c0_32, %c0_33, %c0_34, %c0_35] : memref<1x1x10x10x8xf32, #tpu.memory_space<vmem>>, vector<1x1x10x10x8xf32>
    %56 = vector.shape_cast %55 : vector<1x1x10x10x8xf32> to vector<10x10x8xf32>
    %57 = vector.extract_strided_slice %56 {offsets = [0, 0, 0], sizes = [8, 8, 8], strides = [1, 1, 1]} : vector<10x10x8xf32> to vector<8x8x8xf32>
    %58 = vector.shape_cast %57 : vector<8x8x8xf32> to vector<64x8xf32>
    %c9 = arith.constant 9 : index
    %c0_36 = arith.constant 0 : index
    %c0_37 = arith.constant 0 : index
    %59 = vector.load %arg5[%c9, %c0_36, %c0_37] : memref<27x8x128xf32, #tpu.memory_space<vmem>>, vector<1x8x128xf32>
    %60 = vector.shape_cast %59 : vector<1x8x128xf32> to vector<8x128xf32>
    %cst_38 = arith.constant dense<0.000000e+00> : vector<64x128xf32>
    %61 = tpu.matmul %58, %60, %cst_38 {dimension_numbers = #tpu.dot_dimension_numbers<[1], [0], [0], [1], [0, 0, 1, 1], [], []>} : vector<64x8xf32>, vector<8x128xf32>, vector<64x128xf32> -> vector<64x128xf32>
    %62 = arith.addf %54, %61 : vector<64x128xf32>
    %63 = vector.extract_strided_slice %56 {offsets = [0, 1, 0], sizes = [8, 8, 8], strides = [1, 1, 1]} : vector<10x10x8xf32> to vector<8x8x8xf32>
    %64 = vector.shape_cast %63 : vector<8x8x8xf32> to vector<64x8xf32>
    %c10 = arith.constant 10 : index
    %c0_39 = arith.constant 0 : index
    %c0_40 = arith.constant 0 : index
    %65 = vector.load %arg5[%c10, %c0_39, %c0_40] : memref<27x8x128xf32, #tpu.memory_space<vmem>>, vector<1x8x128xf32>
    %66 = vector.shape_cast %65 : vector<1x8x128xf32> to vector<8x128xf32>
    %cst_41 = arith.constant dense<0.000000e+00> : vector<64x128xf32>
    %67 = tpu.matmul %64, %66, %cst_41 {dimension_numbers = #tpu.dot_dimension_numbers<[1], [0], [0], [1], [0, 0, 1, 1], [], []>} : vector<64x8xf32>, vector<8x128xf32>, vector<64x128xf32> -> vector<64x128xf32>
    %68 = arith.addf %62, %67 : vector<64x128xf32>
    %69 = vector.extract_strided_slice %56 {offsets = [0, 2, 0], sizes = [8, 8, 8], strides = [1, 1, 1]} : vector<10x10x8xf32> to vector<8x8x8xf32>
    %70 = vector.shape_cast %69 : vector<8x8x8xf32> to vector<64x8xf32>
    %c11 = arith.constant 11 : index
    %c0_42 = arith.constant 0 : index
    %c0_43 = arith.constant 0 : index
    %71 = vector.load %arg5[%c11, %c0_42, %c0_43] : memref<27x8x128xf32, #tpu.memory_space<vmem>>, vector<1x8x128xf32>
    %72 = vector.shape_cast %71 : vector<1x8x128xf32> to vector<8x128xf32>
    %cst_44 = arith.constant dense<0.000000e+00> : vector<64x128xf32>
    %73 = tpu.matmul %70, %72, %cst_44 {dimension_numbers = #tpu.dot_dimension_numbers<[1], [0], [0], [1], [0, 0, 1, 1], [], []>} : vector<64x8xf32>, vector<8x128xf32>, vector<64x128xf32> -> vector<64x128xf32>
    %74 = arith.addf %68, %73 : vector<64x128xf32>
    %75 = vector.extract_strided_slice %56 {offsets = [1, 0, 0], sizes = [8, 8, 8], strides = [1, 1, 1]} : vector<10x10x8xf32> to vector<8x8x8xf32>
    %76 = vector.shape_cast %75 : vector<8x8x8xf32> to vector<64x8xf32>
    %c12 = arith.constant 12 : index
    %c0_45 = arith.constant 0 : index
    %c0_46 = arith.constant 0 : index
    %77 = vector.load %arg5[%c12, %c0_45, %c0_46] : memref<27x8x128xf32, #tpu.memory_space<vmem>>, vector<1x8x128xf32>
    %78 = vector.shape_cast %77 : vector<1x8x128xf32> to vector<8x128xf32>
    %cst_47 = arith.constant dense<0.000000e+00> : vector<64x128xf32>
    %79 = tpu.matmul %76, %78, %cst_47 {dimension_numbers = #tpu.dot_dimension_numbers<[1], [0], [0], [1], [0, 0, 1, 1], [], []>} : vector<64x8xf32>, vector<8x128xf32>, vector<64x128xf32> -> vector<64x128xf32>
    %80 = arith.addf %74, %79 : vector<64x128xf32>
    %81 = vector.extract_strided_slice %56 {offsets = [1, 1, 0], sizes = [8, 8, 8], strides = [1, 1, 1]} : vector<10x10x8xf32> to vector<8x8x8xf32>
    %82 = vector.shape_cast %81 : vector<8x8x8xf32> to vector<64x8xf32>
    %c13 = arith.constant 13 : index
    %c0_48 = arith.constant 0 : index
    %c0_49 = arith.constant 0 : index
    %83 = vector.load %arg5[%c13, %c0_48, %c0_49] : memref<27x8x128xf32, #tpu.memory_space<vmem>>, vector<1x8x128xf32>
    %84 = vector.shape_cast %83 : vector<1x8x128xf32> to vector<8x128xf32>
    %cst_50 = arith.constant dense<0.000000e+00> : vector<64x128xf32>
    %85 = tpu.matmul %82, %84, %cst_50 {dimension_numbers = #tpu.dot_dimension_numbers<[1], [0], [0], [1], [0, 0, 1, 1], [], []>} : vector<64x8xf32>, vector<8x128xf32>, vector<64x128xf32> -> vector<64x128xf32>
    %86 = arith.addf %80, %85 : vector<64x128xf32>
    %87 = vector.extract_strided_slice %56 {offsets = [1, 2, 0], sizes = [8, 8, 8], strides = [1, 1, 1]} : vector<10x10x8xf32> to vector<8x8x8xf32>
    %88 = vector.shape_cast %87 : vector<8x8x8xf32> to vector<64x8xf32>
    %c14 = arith.constant 14 : index
    %c0_51 = arith.constant 0 : index
    %c0_52 = arith.constant 0 : index
    %89 = vector.load %arg5[%c14, %c0_51, %c0_52] : memref<27x8x128xf32, #tpu.memory_space<vmem>>, vector<1x8x128xf32>
    %90 = vector.shape_cast %89 : vector<1x8x128xf32> to vector<8x128xf32>
    %cst_53 = arith.constant dense<0.000000e+00> : vector<64x128xf32>
    %91 = tpu.matmul %88, %90, %cst_53 {dimension_numbers = #tpu.dot_dimension_numbers<[1], [0], [0], [1], [0, 0, 1, 1], [], []>} : vector<64x8xf32>, vector<8x128xf32>, vector<64x128xf32> -> vector<64x128xf32>
    %92 = arith.addf %86, %91 : vector<64x128xf32>
    %93 = vector.extract_strided_slice %56 {offsets = [2, 0, 0], sizes = [8, 8, 8], strides = [1, 1, 1]} : vector<10x10x8xf32> to vector<8x8x8xf32>
    %94 = vector.shape_cast %93 : vector<8x8x8xf32> to vector<64x8xf32>
    %c15 = arith.constant 15 : index
    %c0_54 = arith.constant 0 : index
    %c0_55 = arith.constant 0 : index
    %95 = vector.load %arg5[%c15, %c0_54, %c0_55] : memref<27x8x128xf32, #tpu.memory_space<vmem>>, vector<1x8x128xf32>
    %96 = vector.shape_cast %95 : vector<1x8x128xf32> to vector<8x128xf32>
    %cst_56 = arith.constant dense<0.000000e+00> : vector<64x128xf32>
    %97 = tpu.matmul %94, %96, %cst_56 {dimension_numbers = #tpu.dot_dimension_numbers<[1], [0], [0], [1], [0, 0, 1, 1], [], []>} : vector<64x8xf32>, vector<8x128xf32>, vector<64x128xf32> -> vector<64x128xf32>
    %98 = arith.addf %92, %97 : vector<64x128xf32>
    %99 = vector.extract_strided_slice %56 {offsets = [2, 1, 0], sizes = [8, 8, 8], strides = [1, 1, 1]} : vector<10x10x8xf32> to vector<8x8x8xf32>
    %100 = vector.shape_cast %99 : vector<8x8x8xf32> to vector<64x8xf32>
    %c16 = arith.constant 16 : index
    %c0_57 = arith.constant 0 : index
    %c0_58 = arith.constant 0 : index
    %101 = vector.load %arg5[%c16, %c0_57, %c0_58] : memref<27x8x128xf32, #tpu.memory_space<vmem>>, vector<1x8x128xf32>
    %102 = vector.shape_cast %101 : vector<1x8x128xf32> to vector<8x128xf32>
    %cst_59 = arith.constant dense<0.000000e+00> : vector<64x128xf32>
    %103 = tpu.matmul %100, %102, %cst_59 {dimension_numbers = #tpu.dot_dimension_numbers<[1], [0], [0], [1], [0, 0, 1, 1], [], []>} : vector<64x8xf32>, vector<8x128xf32>, vector<64x128xf32> -> vector<64x128xf32>
    %104 = arith.addf %98, %103 : vector<64x128xf32>
    %105 = vector.extract_strided_slice %56 {offsets = [2, 2, 0], sizes = [8, 8, 8], strides = [1, 1, 1]} : vector<10x10x8xf32> to vector<8x8x8xf32>
    %106 = vector.shape_cast %105 : vector<8x8x8xf32> to vector<64x8xf32>
    %c17 = arith.constant 17 : index
    %c0_60 = arith.constant 0 : index
    %c0_61 = arith.constant 0 : index
    %107 = vector.load %arg5[%c17, %c0_60, %c0_61] : memref<27x8x128xf32, #tpu.memory_space<vmem>>, vector<1x8x128xf32>
    %108 = vector.shape_cast %107 : vector<1x8x128xf32> to vector<8x128xf32>
    %cst_62 = arith.constant dense<0.000000e+00> : vector<64x128xf32>
    %109 = tpu.matmul %106, %108, %cst_62 {dimension_numbers = #tpu.dot_dimension_numbers<[1], [0], [0], [1], [0, 0, 1, 1], [], []>} : vector<64x8xf32>, vector<8x128xf32>, vector<64x128xf32> -> vector<64x128xf32>
    %110 = arith.addf %104, %109 : vector<64x128xf32>
    %c0_63 = arith.constant 0 : index
    %c0_64 = arith.constant 0 : index
    %c0_65 = arith.constant 0 : index
    %c0_66 = arith.constant 0 : index
    %c0_67 = arith.constant 0 : index
    %111 = vector.load %arg4[%c0_63, %c0_64, %c0_65, %c0_66, %c0_67] : memref<1x1x10x10x8xf32, #tpu.memory_space<vmem>>, vector<1x1x10x10x8xf32>
    %112 = vector.shape_cast %111 : vector<1x1x10x10x8xf32> to vector<10x10x8xf32>
    %113 = vector.extract_strided_slice %112 {offsets = [0, 0, 0], sizes = [8, 8, 8], strides = [1, 1, 1]} : vector<10x10x8xf32> to vector<8x8x8xf32>
    %114 = vector.shape_cast %113 : vector<8x8x8xf32> to vector<64x8xf32>
    %c18 = arith.constant 18 : index
    %c0_68 = arith.constant 0 : index
    %c0_69 = arith.constant 0 : index
    %115 = vector.load %arg5[%c18, %c0_68, %c0_69] : memref<27x8x128xf32, #tpu.memory_space<vmem>>, vector<1x8x128xf32>
    %116 = vector.shape_cast %115 : vector<1x8x128xf32> to vector<8x128xf32>
    %cst_70 = arith.constant dense<0.000000e+00> : vector<64x128xf32>
    %117 = tpu.matmul %114, %116, %cst_70 {dimension_numbers = #tpu.dot_dimension_numbers<[1], [0], [0], [1], [0, 0, 1, 1], [], []>} : vector<64x8xf32>, vector<8x128xf32>, vector<64x128xf32> -> vector<64x128xf32>
    %118 = arith.addf %110, %117 : vector<64x128xf32>
    %119 = vector.extract_strided_slice %112 {offsets = [0, 1, 0], sizes = [8, 8, 8], strides = [1, 1, 1]} : vector<10x10x8xf32> to vector<8x8x8xf32>
    %120 = vector.shape_cast %119 : vector<8x8x8xf32> to vector<64x8xf32>
    %c19 = arith.constant 19 : index
    %c0_71 = arith.constant 0 : index
    %c0_72 = arith.constant 0 : index
    %121 = vector.load %arg5[%c19, %c0_71, %c0_72] : memref<27x8x128xf32, #tpu.memory_space<vmem>>, vector<1x8x128xf32>
    %122 = vector.shape_cast %121 : vector<1x8x128xf32> to vector<8x128xf32>
    %cst_73 = arith.constant dense<0.000000e+00> : vector<64x128xf32>
    %123 = tpu.matmul %120, %122, %cst_73 {dimension_numbers = #tpu.dot_dimension_numbers<[1], [0], [0], [1], [0, 0, 1, 1], [], []>} : vector<64x8xf32>, vector<8x128xf32>, vector<64x128xf32> -> vector<64x128xf32>
    %124 = arith.addf %118, %123 : vector<64x128xf32>
    %125 = vector.extract_strided_slice %112 {offsets = [0, 2, 0], sizes = [8, 8, 8], strides = [1, 1, 1]} : vector<10x10x8xf32> to vector<8x8x8xf32>
    %126 = vector.shape_cast %125 : vector<8x8x8xf32> to vector<64x8xf32>
    %c20 = arith.constant 20 : index
    %c0_74 = arith.constant 0 : index
    %c0_75 = arith.constant 0 : index
    %127 = vector.load %arg5[%c20, %c0_74, %c0_75] : memref<27x8x128xf32, #tpu.memory_space<vmem>>, vector<1x8x128xf32>
    %128 = vector.shape_cast %127 : vector<1x8x128xf32> to vector<8x128xf32>
    %cst_76 = arith.constant dense<0.000000e+00> : vector<64x128xf32>
    %129 = tpu.matmul %126, %128, %cst_76 {dimension_numbers = #tpu.dot_dimension_numbers<[1], [0], [0], [1], [0, 0, 1, 1], [], []>} : vector<64x8xf32>, vector<8x128xf32>, vector<64x128xf32> -> vector<64x128xf32>
    %130 = arith.addf %124, %129 : vector<64x128xf32>
    %131 = vector.extract_strided_slice %112 {offsets = [1, 0, 0], sizes = [8, 8, 8], strides = [1, 1, 1]} : vector<10x10x8xf32> to vector<8x8x8xf32>
    %132 = vector.shape_cast %131 : vector<8x8x8xf32> to vector<64x8xf32>
    %c21 = arith.constant 21 : index
    %c0_77 = arith.constant 0 : index
    %c0_78 = arith.constant 0 : index
    %133 = vector.load %arg5[%c21, %c0_77, %c0_78] : memref<27x8x128xf32, #tpu.memory_space<vmem>>, vector<1x8x128xf32>
    %134 = vector.shape_cast %133 : vector<1x8x128xf32> to vector<8x128xf32>
    %cst_79 = arith.constant dense<0.000000e+00> : vector<64x128xf32>
    %135 = tpu.matmul %132, %134, %cst_79 {dimension_numbers = #tpu.dot_dimension_numbers<[1], [0], [0], [1], [0, 0, 1, 1], [], []>} : vector<64x8xf32>, vector<8x128xf32>, vector<64x128xf32> -> vector<64x128xf32>
    %136 = arith.addf %130, %135 : vector<64x128xf32>
    %137 = vector.extract_strided_slice %112 {offsets = [1, 1, 0], sizes = [8, 8, 8], strides = [1, 1, 1]} : vector<10x10x8xf32> to vector<8x8x8xf32>
    %138 = vector.shape_cast %137 : vector<8x8x8xf32> to vector<64x8xf32>
    %c22 = arith.constant 22 : index
    %c0_80 = arith.constant 0 : index
    %c0_81 = arith.constant 0 : index
    %139 = vector.load %arg5[%c22, %c0_80, %c0_81] : memref<27x8x128xf32, #tpu.memory_space<vmem>>, vector<1x8x128xf32>
    %140 = vector.shape_cast %139 : vector<1x8x128xf32> to vector<8x128xf32>
    %cst_82 = arith.constant dense<0.000000e+00> : vector<64x128xf32>
    %141 = tpu.matmul %138, %140, %cst_82 {dimension_numbers = #tpu.dot_dimension_numbers<[1], [0], [0], [1], [0, 0, 1, 1], [], []>} : vector<64x8xf32>, vector<8x128xf32>, vector<64x128xf32> -> vector<64x128xf32>
    %142 = arith.addf %136, %141 : vector<64x128xf32>
    %143 = vector.extract_strided_slice %112 {offsets = [1, 2, 0], sizes = [8, 8, 8], strides = [1, 1, 1]} : vector<10x10x8xf32> to vector<8x8x8xf32>
    %144 = vector.shape_cast %143 : vector<8x8x8xf32> to vector<64x8xf32>
    %c23 = arith.constant 23 : index
    %c0_83 = arith.constant 0 : index
    %c0_84 = arith.constant 0 : index
    %145 = vector.load %arg5[%c23, %c0_83, %c0_84] : memref<27x8x128xf32, #tpu.memory_space<vmem>>, vector<1x8x128xf32>
    %146 = vector.shape_cast %145 : vector<1x8x128xf32> to vector<8x128xf32>
    %cst_85 = arith.constant dense<0.000000e+00> : vector<64x128xf32>
    %147 = tpu.matmul %144, %146, %cst_85 {dimension_numbers = #tpu.dot_dimension_numbers<[1], [0], [0], [1], [0, 0, 1, 1], [], []>} : vector<64x8xf32>, vector<8x128xf32>, vector<64x128xf32> -> vector<64x128xf32>
    %148 = arith.addf %142, %147 : vector<64x128xf32>
    %149 = vector.extract_strided_slice %112 {offsets = [2, 0, 0], sizes = [8, 8, 8], strides = [1, 1, 1]} : vector<10x10x8xf32> to vector<8x8x8xf32>
    %150 = vector.shape_cast %149 : vector<8x8x8xf32> to vector<64x8xf32>
    %c24 = arith.constant 24 : index
    %c0_86 = arith.constant 0 : index
    %c0_87 = arith.constant 0 : index
    %151 = vector.load %arg5[%c24, %c0_86, %c0_87] : memref<27x8x128xf32, #tpu.memory_space<vmem>>, vector<1x8x128xf32>
    %152 = vector.shape_cast %151 : vector<1x8x128xf32> to vector<8x128xf32>
    %cst_88 = arith.constant dense<0.000000e+00> : vector<64x128xf32>
    %153 = tpu.matmul %150, %152, %cst_88 {dimension_numbers = #tpu.dot_dimension_numbers<[1], [0], [0], [1], [0, 0, 1, 1], [], []>} : vector<64x8xf32>, vector<8x128xf32>, vector<64x128xf32> -> vector<64x128xf32>
    %154 = arith.addf %148, %153 : vector<64x128xf32>
    %155 = vector.extract_strided_slice %112 {offsets = [2, 1, 0], sizes = [8, 8, 8], strides = [1, 1, 1]} : vector<10x10x8xf32> to vector<8x8x8xf32>
    %156 = vector.shape_cast %155 : vector<8x8x8xf32> to vector<64x8xf32>
    %c25 = arith.constant 25 : index
    %c0_89 = arith.constant 0 : index
    %c0_90 = arith.constant 0 : index
    %157 = vector.load %arg5[%c25, %c0_89, %c0_90] : memref<27x8x128xf32, #tpu.memory_space<vmem>>, vector<1x8x128xf32>
    %158 = vector.shape_cast %157 : vector<1x8x128xf32> to vector<8x128xf32>
    %cst_91 = arith.constant dense<0.000000e+00> : vector<64x128xf32>
    %159 = tpu.matmul %156, %158, %cst_91 {dimension_numbers = #tpu.dot_dimension_numbers<[1], [0], [0], [1], [0, 0, 1, 1], [], []>} : vector<64x8xf32>, vector<8x128xf32>, vector<64x128xf32> -> vector<64x128xf32>
    %160 = arith.addf %154, %159 : vector<64x128xf32>
    %161 = vector.extract_strided_slice %112 {offsets = [2, 2, 0], sizes = [8, 8, 8], strides = [1, 1, 1]} : vector<10x10x8xf32> to vector<8x8x8xf32>
    %162 = vector.shape_cast %161 : vector<8x8x8xf32> to vector<64x8xf32>
    %c26 = arith.constant 26 : index
    %c0_92 = arith.constant 0 : index
    %c0_93 = arith.constant 0 : index
    %163 = vector.load %arg5[%c26, %c0_92, %c0_93] : memref<27x8x128xf32, #tpu.memory_space<vmem>>, vector<1x8x128xf32>
    %164 = vector.shape_cast %163 : vector<1x8x128xf32> to vector<8x128xf32>
    %cst_94 = arith.constant dense<0.000000e+00> : vector<64x128xf32>
    %165 = tpu.matmul %162, %164, %cst_94 {dimension_numbers = #tpu.dot_dimension_numbers<[1], [0], [0], [1], [0, 0, 1, 1], [], []>} : vector<64x8xf32>, vector<8x128xf32>, vector<64x128xf32> -> vector<64x128xf32>
    %166 = arith.addf %160, %165 : vector<64x128xf32>
    %c0_95 = arith.constant 0 : index
    %c0_96 = arith.constant 0 : index
    %167 = vector.load %arg6[%c0_95, %c0_96] : memref<2x128xf32, #tpu.memory_space<vmem>>, vector<1x128xf32>
    %c1_97 = arith.constant 1 : index
    %c0_98 = arith.constant 0 : index
    %168 = vector.load %arg6[%c1_97, %c0_98] : memref<2x128xf32, #tpu.memory_space<vmem>>, vector<1x128xf32>
    %169 = vector.broadcast %167 : vector<1x128xf32> to vector<64x128xf32>
    %170 = arith.mulf %166, %169 : vector<64x128xf32>
    %171 = vector.broadcast %168 : vector<1x128xf32> to vector<64x128xf32>
    %172 = arith.addf %170, %171 : vector<64x128xf32>
    %cst_99 = arith.constant 0.000000e+00 : f32
    %173 = vector.broadcast %cst_99 : f32 to vector<64x128xf32>
    %174 = arith.maximumf %172, %173 : vector<64x128xf32>
    %175 = vector.shape_cast %174 : vector<64x128xf32> to vector<1x1x8x8x128xf32>
    %c0_100 = arith.constant 0 : index
    %c0_101 = arith.constant 0 : index
    %c0_102 = arith.constant 0 : index
    %c0_103 = arith.constant 0 : index
    %c0_104 = arith.constant 0 : index
    %176 = vector.load %arg7[%c0_100, %c0_101, %c0_102, %c0_103, %c0_104] : memref<1x1x8x8x128xf32, #tpu.memory_space<vmem>>, vector<1x1x8x8x128xf32>
    tpu.vector_store %arg7[%c0_100, %c0_101, %c0_102, %c0_103, %c0_104], %175 {strides = array<i32>} : memref<1x1x8x8x128xf32, #tpu.memory_space<vmem>>, vector<1x1x8x8x128xf32>,
    return
  }
  func.func @transform_0(%arg0: i32, %arg1: i32) -> (i32, i32, i32, i32, i32) {
    %c0_i32 = arith.constant 0 : i32
    %c0_i32_0 = arith.constant 0 : i32
    %c0_i32_1 = arith.constant 0 : i32
    %c0_i32_2 = arith.constant 0 : i32
    return %arg0, %arg1, %c0_i32, %c0_i32_0, %c0_i32_1 : i32, i32, i32, i32, i32
  }
  func.func @transform_1(%arg0: i32, %arg1: i32) -> (i32, i32, i32, i32, i32) {
    %c1_i32 = arith.constant 1 : i32
    %0 = arith.addi %arg1, %c1_i32 : i32
    %c0_i32 = arith.constant 0 : i32
    %c0_i32_0 = arith.constant 0 : i32
    %c0_i32_1 = arith.constant 0 : i32
    %c0_i32_2 = arith.constant 0 : i32
    return %arg0, %0, %c0_i32, %c0_i32_0, %c0_i32_1 : i32, i32, i32, i32, i32
  }
  func.func @transform_2(%arg0: i32, %arg1: i32) -> (i32, i32, i32, i32, i32) {
    %c2_i32 = arith.constant 2 : i32
    %0 = arith.addi %arg1, %c2_i32 : i32
    %c0_i32 = arith.constant 0 : i32
    %c0_i32_0 = arith.constant 0 : i32
    %c0_i32_1 = arith.constant 0 : i32
    %c0_i32_2 = arith.constant 0 : i32
    return %arg0, %0, %c0_i32, %c0_i32_0, %c0_i32_1 : i32, i32, i32, i32, i32
  }
  func.func @transform_3(%arg0: i32, %arg1: i32) -> (i32, i32, i32) {
    %c0_i32 = arith.constant 0 : i32
    %c0_i32_0 = arith.constant 0 : i32
    %c0_i32_1 = arith.constant 0 : i32
    %c0_i32_2 = arith.constant 0 : i32
    return %c0_i32, %c0_i32_0, %c0_i32_1 : i32, i32, i32
  }
  func.func @transform_4(%arg0: i32, %arg1: i32) -> (i32, i32) {
    %c0_i32 = arith.constant 0 : i32
    %c0_i32_0 = arith.constant 0 : i32
    %c0_i32_1 = arith.constant 0 : i32
    return %c0_i32, %c0_i32_0 : i32, i32
  }
  func.func @transform_5(%arg0: i32, %arg1: i32) -> (i32, i32, i32, i32, i32) {
    %c0_i32 = arith.constant 0 : i32
    %c0_i32_0 = arith.constant 0 : i32
    %c0_i32_1 = arith.constant 0 : i32
    %c0_i32_2 = arith.constant 0 : i32
    return %arg0, %arg1, %c0_i32, %c0_i32_0, %c0_i32_1 : i32, i32, i32, i32, i32
  }
}

</mosaic_0001>

<bundles_post_ra>
// kernel: tpu_custom_call.1
= control target key start
LH: loop header
LB: loop body
LE: loop exit
PB: predicated region body
PF: predicated region fallthrough
CT: control target
= control target key end

     0   :  { %10 = vsyncpa [#allocation3], 0  ;;  %s6388_s0 = inlined_call_operand.vmem [shape: f32[2,10,10,10,8], index: 0, kind: input, shape index: {}]   ;;  %s6389_s1 = inlined_call_operand.vmem [shape: f32[2,10,10,10,8], index: 1, kind: input, shape index: {}]   ;;  %s6390_s2 = inlined_call_operand.vmem [shape: f32[2,10,10,10,8], index: 2, kind: input, shape index: {}]   ;;  %s6391_s3 = inlined_call_operand.vmem [shape: f32[27,8,128], index: 3, kind: input, shape index: {}]   ;;  %s6392_s4 = inlined_call_operand.vmem [shape: f32[2,128], index: 4, kind: input, shape index: {}]   ;;  %s6393_s5 = inlined_call_operand.hbm [shape: f32[2,8,8,8,128], index: 5, kind: output, shape index: {}]  }
   0x1   :  { %12 = vsyncpa [#allocation3 + $0x1], 0  ;;  %s5175_s18 = smov 0   ;;  %s5177_s19 = smov 0  }
   0x2   :  { %s5179_s20 = smov 0   ;;  %s5181_s21 = smov 0  }
   0x3   :  { %s5183_s22 = smov 0   ;;  %s5185_s23 = smov 0  }
   0x4   :  { %s5187_s24 = smov 0   ;;  %s5189_s25 = smov 0  }
   0x5 LB: > { %s4089_s26 = sadd.s32 4294967295, %s5140_s25   ;;  %s4090_s27 = sadd.s32 4294967294, %s5140_s25   ;;  %s5140_s25 = sphi %s5189_s25, %s18_s25   ;;  %s5136_s24 = sphi %s5187_s24, %s6422_s24   ;;  %s5132_s23 = sphi %s5185_s23, %s6421_s23   ;;  %s5128_s22 = sphi %s5183_s22, %s6420_s22   ;;  %s5124_s21 = sphi %s5181_s21, %s6419_s21   ;;  %s5120_s20 = sphi %s5179_s20, %s6418_s20   ;;  %s5116_s19 = sphi %s5177_s19, %s6417_s19   ;;  %s5112_s18 = sphi %s5175_s18, %s6416_s18  }
   0x6   : > { %s27_s28 = sadd.s32 1, %s5132_s23  ;;  %s30_s29 = sadd.s32 1, %s5136_s24 }
   0x7   : > { %p28_p0 = scmp.ge.s32.totalorder %s27_s28, 8  ;;  %p179_p1 = scmp.ne.s32.totalorder %s5120_s20, %s5116_s19 }
   0x8   : > { %p180_p2 = scmp.eq.s32.totalorder %s4089_s26, 15  ;;  %p185_p5 = scmp.ne.s32.totalorder %s5116_s19, %s5112_s18 }
   0x9   : > { %s6424_s28 = smov (%p28_p0, %s27_s28), 0  ;;  %s6426_s29 = smov (!%p28_p0, %s30_s29), %s5136_s24 }
   0xa   : > { %s165_s30 = ssub.s32 %s5132_s23, %s6424_s28  ;;  %p5226_p3 = por %p180_p2, %p179_p1 }
   0xb   : > { %p32_p4 = scmp.ge.s32.totalorder %s6426_s29, 2  ;;  %p186_p6 = scmp.eq.s32.totalorder %s4090_s27, 15 }
   0xc   : > { %p4093_p7 = scmp.ge.s32.totalorder %s5140_s25, 1  ;;  %p250_p9 = scmp.lt.s32.totalorder %s5140_s25, 17 }
   0xd   : > { %s6428_s29 = smov (%p32_p4, %s6426_s29), 0  ;;  %p5235_p8 = por %p186_p6, %p185_p5 }
   0xe   : > { %s164_s8 = ssub.s32 %s5136_s24, %s6428_s29  ;;  %s169_s9 = sadd.s32 1, %s5120_s20 }
   0xf   : > { %s166_s10 = sor.u32 %s165_s30, %s164_s8  ;;  %p251_p10 = pnand %p4093_p7, %p250_p9 }
  0x10   : > { %p167_p11 = scmp.eq.s32.totalorder %s166_s10, 0 }
  0x11   : > { %254 = sbr.rel (%p251_p10) target bundleno = 470 (0x1d6), region = 40 }
  0x12   : > { %s5244_s11 = scalar_select %p167_p11, %s5120_s20, %s169_s9  }
  0x16   : > { %v4098_v0 = vld [vmem:[%s6391_s3 + $0x8] sm:$0xff]  ;;  %p302_p12 = scmp.lt.s32.totalorder %s5128_s22, 1  ;;  %p304_p13 = scmp.lt.s32.totalorder %s5124_s21, 9  ;;  %v5254_v1 = vld [vmem:[%s6391_s3] sm:$0xff]  ;;  %v4115_v2 = vld [vmem:[%s6391_s3 + $0x10] sm:$0xff]  ;;  %vm370_vm0 = vcmask 1046528  }
  0x17   : > { %4969 = vmatprep.subr.mxu1 %v4098_v0  ;;  %4591 = vmatprep.subr.mxu0 %v4098_v0  ;;  %vm397_vm1 = vcmask 64512   ;;  %vm640_vm2 = vcmask 1045504   ;;  %v4124_v28 = vld [vmem:[%s6391_s3 + $0x18] sm:$0xff]  ;;  %v4133_v44 = vld [vmem:[%s6391_s3 + $0x20] sm:$0xff]  ;;  %v4142_v58 = vld [vmem:[%s6391_s3 + $0x28] sm:$0xff]  ;;  %s311_s17 = sadd.s32 1, %s5124_s21 }
  0x18   : > { %4970 = vmatpush3.msra.mxu1 %v4098_v0  ;;  %4592 = vmatpush3.msra.mxu0 %v4098_v0  ;;  %s303_s26 = scalar_select %p302_p12, %s5128_s22, 1  ;;  %v4151_v62 = vld [vmem:[%s6391_s3 + $0x30] sm:$0xff] }
  0x19   : > { %s305_s27 = scalar_select %p304_p13, %s5124_s21, 9  ;;  %4605 = vmatprep.subr.mxu1 %v5254_v1  ;;  %4619 = vmatprep.subr.mxu0 %v4115_v2 }
  0x1a   : > { %s5262_s30 = smul.u32 200, %s303_s26  ;;  %p314_p0 = scmp.lt.s32.totalorder %s311_s17, 9 }
  0x1b   : > { %s4971_s8 = smul.u32 20, %s305_s27  ;;  %s4343_s27 = sshll.u32 %s5124_s21, 3 }
  0x1c   : > { %s6430_s17 = smov (!%p314_p0, %s311_s17), 9  ;;  %s5142_s16 = smov [#allocation2]  }
  0x1d   : > { %s308_s9 = sadd.s32 %s5262_s30, %s4971_s8  ;;  %s4344_s8 = sshll.u32 %s5128_s22, 6 }
  0x1e   : > { %s4095_s10 = sshll.u32 %s308_s9, 3 }
  0x1f   : > { %s5268_s14 = scalar_lea.vmem %s6388_s0, %s4095_s10  ;;  %s4973_s10 = smul.u32 20, %s6430_s17 }
  0x20   : > { %v5271_v3 = vld [vmem:[%s5268_s14] sm:$0xff]  ;;  %v334_v4 = vld [vmem:[%s5268_s14 + $0x8] sm:$0x3]  ;;  %v5284_v12 = vld [vmem:[%s5268_s14 + $0x10] sm:$0xff] }
  0x21   : > { %v5275_v5 = vld [vmem:[%s5268_s14 + $0x40] sm:$0xff]  ;;  %v371_v6 = vrot.slane %v5271_v3, 1  ;;  %v372_v7 = vrot.slane %v334_v4, 1  ;;  %v642_v8 = vrot.slane %v334_v4, 2  ;;  %v5279_v9 = vld [vmem:[%s5268_s14 + $0x48] sm:$0x3]  ;;  %s318_s12 = sadd.s32 %s4973_s10, %s5262_s30 }
  0x22   : > { %v383_v10 = vrot.slane %v5275_v5, 1  ;;  %v384_v11 = vrot.slane %v5279_v9, 1  ;;  %v336_v13 = vld [vmem:[%s5268_s14 + $0x18] sm:$0x3]  ;;  %v5288_v14 = vld [vmem:[%s5268_s14 + $0x50] sm:$0xff]  ;;  %v641_v15 = vrot.slane %v5271_v3, 2 }
  0x23   : > { %v373_v16 = vsel %vm370_vm0, %v371_v6, %v372_v7  ;;  %v374_v17 = vrot.slane %v5284_v12, 1  ;;  %v375_v18 = vrot.slane %v336_v13, 1  ;;  %v645_v19 = vrot.slane %v336_v13, 2  ;;  %v5294_v20 = vld [vmem:[%s5268_s14 + $0x58] sm:$0x3]  ;;  %v5297_v21 = vld [vmem:[%s5268_s14 + $0x20] sm:$0xff] }
  0x24   : > { %4593 = vmatprep.mubr.msk.f32.mxu0 %vm397_vm1, %v373_v16  ;;  %v5301_v22 = vsel %vm370_vm0, %v383_v10, %v384_v11  ;;  %v386_v23 = vrot.slane %v5288_v14, 1  ;;  %v387_v24 = vrot.slane %v5294_v20, 1  ;;  %v338_v25 = vld [vmem:[%s5268_s14 + $0x28] sm:$0x3]  ;;  %v377_v26 = vrot.slane %v5297_v21, 1  ;;  %v5308_v27 = vld [vmem:[%s5268_s14 + $0x60] sm:$0xff] }
  0x25   : > { %4599 = vmatprep.mubr.msk.f32.mxu1 %vm397_vm1, %v5301_v22  ;;  %v5316_v29 = vsel %vm370_vm0, %v374_v17, %v375_v18  ;;  %v378_v30 = vrot.slane %v338_v25, 1  ;;  %v5319_v31 = vld [vmem:[%s5268_s14 + $0x68] sm:$0x3]  ;;  %v389_v32 = vrot.slane %v5308_v27, 1  ;;  %v5323_v33 = vld [vmem:[%s5268_s14 + $0x30] sm:$0xff]  ;;  %v643_v46 = vsel %vm640_vm2, %v641_v15, %v642_v8  ;;  %v4160_v8 = vld [vmem:[%s6391_s3 + $0x38] sm:$0xff] }
  0x26   : > { %v5326_v34 = vld [vmem:[%s5268_s14 + $0x70] sm:$0xff]  ;;  %4594 = vmatmul.mubr.msk.f32.vlgmr.msra.gmra.mxu0 %vm397_vm1, %v5316_v29  ;;  %v5331_v35 = vsel %vm370_vm0, %v386_v23, %v387_v24  ;;  %v390_v36 = vrot.slane %v5319_v31, 1  ;;  %v340_v37 = vld [vmem:[%s5268_s14 + $0x38] sm:$0x3]  ;;  %v380_v38 = vrot.slane %v5323_v33, 1  ;;  %v644_v47 = vrot.slane %v5284_v12, 2 }
  0x27   : > { %v348_v39 = vld [vmem:[%s5268_s14 + $0x78] sm:$0x3]  ;;  %4600 = vmatmul.mubr.msk.f32.vlgmr.msra.gmra.mxu1 %vm397_vm1, %v5331_v35  ;;  %4620 = vmatpush3.msra.mxu0 %v4115_v2  ;;  %v5340_v40 = vsel %vm370_vm0, %v377_v26, %v378_v30  ;;  %v381_v41 = vrot.slane %v340_v37, 1  ;;  %v392_v42 = vrot.slane %v5326_v34, 1  ;;  %v647_v50 = vrot.slane %v5297_v21, 2  ;;  %v349_v10 = vld [vmem:[%s5268_s14 + $0x80] sm:$0xff] }
  0x28   : > { %v393_v43 = vrot.slane %v348_v39, 1  ;;  %4606 = vmatpush3.msra.mxu1 %v5254_v1  ;;  %4596 = vmatprep.mubr.msk.f32.mxu0 %vm397_vm1, %v5340_v40  ;;  %v5350_v45 = vsel %vm370_vm0, %v389_v32, %v390_v36  ;;  %v648_v51 = vrot.slane %v338_v25, 2  ;;  %v5369_v52 = vsel %vm640_vm2, %v644_v47, %v645_v19  ;;  %v350_v11 = vld [vmem:[%s5268_s14 + $0x88] sm:$0x3]  ;;  %v4187_v17 = vld [vmem:[%s6391_s3 + $0x50] sm:$0xff]  ;;  %s4096_s13 = sshll.u32 %s318_s12, 3 }
  0x29   : > { %4602 = vmatprep.mubr.msk.f32.mxu1 %vm397_vm1, %v5350_v45  ;;  %v5357_v48 = vsel %vm370_vm0, %v380_v38, %v381_v41  ;;  %4633 = vmatprep.subr.mxu1 %v4124_v28  ;;  %v650_v53 = vrot.slane %v5323_v33, 2  ;;  %v651_v54 = vrot.slane %v340_v37, 2  ;;  %v653_v55 = vrot.slane %v5275_v5, 2  ;;  %v4178_v16 = vld [vmem:[%s6391_s3 + $0x48] sm:$0xff]  ;;  %s5523_s17 = scalar_lea.vmem %s6389_s1, %s4096_s13  ;;  %s322_s10 = sadd.s32 2, %s5124_s21 }
  0x2a   : > { %v5360_v49 = vsel %vm370_vm0, %v392_v42, %v393_v43  ;;  %4597 = vmatmul.mubr.msk.f32.gmra.mxu0 %vm397_vm1, %v5357_v48  ;;  %4647 = vmatprep.subr.mxu0 %v4133_v44  ;;  %v654_v56 = vrot.slane %v5279_v9, 2  ;;  %v5379_v57 = vsel %vm640_vm2, %v647_v50, %v648_v51  ;;  %v656_v60 = vrot.slane %v5288_v14, 2  ;;  %v4169_v9 = vld [vmem:[%s6391_s3 + $0x40] sm:$0xff]  ;;  %v352_v23 = vld [vmem:[%s5268_s14 + $0x98] sm:$0x3]  ;;  %p325_p1 = scmp.lt.s32.totalorder %s322_s10, 9 }
  0x2b   : > { %4603 = vmatmul.mubr.msk.f32.gmra.mxu1 %vm397_vm1, %v5360_v49  ;;  %4621 = vmatprep.mubr.msk.f32.mxu0 %vm397_vm1, %v643_v46  ;;  %v5387_v59 = vsel %vm640_vm2, %v650_v53, %v651_v54  ;;  %v657_v61 = vrot.slane %v5294_v20, 2  ;;  %v659_v0 = vrot.slane %v5308_v27, 2  ;;  %v660_v1 = vrot.slane %v5319_v31, 2  ;;  %v5528_v20 = vld [vmem:[%s6391_s3 + $0x58] sm:$0xff]  ;;  %v5542_v24 = vld [vmem:[%s5523_s17] sm:$0xff]  ;;  %v5612_v51 = vld [vmem:[%s5523_s17 + $0x50] sm:$0xff] }
  0x2c   : > { %4607 = vmatprep.mubr.msk.f32.mxu1 %vm397_vm1, %v5271_v3  ;;  %v5397_v63 = vsel %vm640_vm2, %v653_v55, %v654_v56  ;;  %v662_v3 = vrot.slane %v5326_v34, 2  ;;  %v663_v4 = vrot.slane %v348_v39, 2  ;;  %v916_v13 = vrot.slane %v350_v11, 1  ;;  %v5545_v25 = vld [vmem:[%s5523_s17 + $0x8] sm:$0x3]  ;;  %s6432_s10 = smov (!%p325_p1, %s322_s10), 9 }
  0x2d   : > { %v5410_v2 = vsel %vm640_vm2, %v656_v60, %v657_v61  ;;  %v5416_v6 = vsel %vm640_vm2, %v659_v0, %v660_v1  ;;  %v1035_v18 = vrot.slane %v349_v10, 2  ;;  %v1036_v19 = vrot.slane %v350_v11, 2  ;;  %v5562_v32 = vld [vmem:[%s5523_s17 + $0x18] sm:$0x3]  ;;  %v5575_v36 = vld [vmem:[%s5523_s17 + $0x20] sm:$0xff]  ;;  %v4214_v56 = vld [vmem:[%s6391_s3 + $0x68] sm:$0xff] }
  0x2e   : > { %4622 = vmatmul.mubr.msk.f32.vlgmr.msra.gmra.mxu0 %vm397_vm1, %v5369_v52  ;;  %v5425_v7 = vsel %vm640_vm2, %v662_v3, %v663_v4  ;;  %v1681_v30 = vrot.slane %v5542_v24, 1  ;;  %v1682_v31 = vrot.slane %v5545_v25, 1  ;;  %v5578_v37 = vld [vmem:[%s5523_s17 + $0x28] sm:$0x3]  ;;  %v5588_v41 = vld [vmem:[%s5523_s17 + $0x38] sm:$0x3] }
  0x2f   : > { %4608 = vmatmul.mubr.msk.f32.vlgmr.msra.gmra.mxu1 %vm397_vm1, %v5284_v12  ;;  %4648 = vmatpush3.msra.mxu0 %v4133_v44  ;;  %v5591_v42 = vld [vmem:[%s5523_s17 + $0x40] sm:$0xff]  ;;  %v5594_v43 = vld [vmem:[%s5523_s17 + $0x48] sm:$0x3]  ;;  %v1687_v44 = vrot.slane %v5575_v36, 1  ;;  %v4223_v60 = vld [vmem:[%s6391_s3 + $0x70] sm:$0xff] }
  0x30   : > { %4634 = vmatpush3.msra.mxu1 %v4124_v28  ;;  %4610 = vmatprep.mubr.msk.f32.mxu1 %vm397_vm1, %v5297_v21  ;;  %v1683_v39 = vsel %vm370_vm0, %v1681_v30, %v1682_v31  ;;  %v1694_v50 = vrot.slane %v5594_v43, 1  ;;  %v5618_v53 = vld [vmem:[%s5523_s17 + $0x60] sm:$0xff]  ;;  %v5621_v54 = vld [vmem:[%s5523_s17 + $0x68] sm:$0x3]  ;;  %v5651_v0 = vld [vmem:[%s5523_s17 + $0x70] sm:$0xff]  ;;  %v1851_v31 = vrot.slane %v5612_v51, 2 }
  0x31   : > { %4624 = vmatprep.mubr.msk.f32.mxu0 %vm397_vm1, %v5379_v57  ;;  %4661 = vmatprep.subr.mxu1 %v4142_v58  ;;  %v5654_v1 = vld [vmem:[%s5523_s17 + $0x78] sm:$0x3]  ;;  %v1702_v3 = vrot.slane %v5651_v0, 1 }
  0x32   : > { %4625 = vmatmul.mubr.msk.f32.gmra.mxu0 %vm397_vm1, %v5387_v59  ;;  %4675 = vmatprep.subr.mxu0 %v4151_v62  ;;  %v1703_v4 = vrot.slane %v5654_v1, 1 }
  0x33   : > { %4611 = vmatmul.mubr.msk.f32.gmra.mxu1 %vm397_vm1, %v5323_v33  ;;  %4627 = vmatprep.mubr.msk.f32.mxu0 %vm397_vm1, %v5397_v63 }
  0x34   : > { %4613 = vmatprep.mubr.msk.f32.mxu1 %vm397_vm1, %v5275_v5 }
  0x36   : > { %4628 = vmatmul.mubr.msk.f32.gmra.mxu0 %vm397_vm1, %v5410_v2 }
  0x37   : > { %4614 = vmatmul.mubr.msk.f32.gmra.mxu1 %vm397_vm1, %v5288_v14  ;;  %4630 = vmatprep.mubr.msk.f32.mxu0 %vm397_vm1, %v5416_v6 }
  0x38   : > { %4616 = vmatprep.mubr.msk.f32.mxu1 %vm397_vm1, %v5308_v27 }
  0x3a   : > { %4631 = vmatmul.mubr.msk.f32.gmra.mxu0 %vm397_vm1, %v5425_v7 }
  0x3b   : > { %4617 = vmatmul.mubr.msk.f32.gmra.mxu1 %vm397_vm1, %v5326_v34  ;;  %4649 = vmatprep.mubr.msk.f32.mxu0 %vm397_vm1, %v5316_v29  ;;  %v1275_v29 = vrot.slane %v352_v23, 1 }
  0x3c   : > { %4635 = vmatprep.mubr.msk.f32.mxu1 %vm397_vm1, %v5284_v12  ;;  %v915_v12 = vrot.slane %v349_v10, 1 }
  0x3e   : > { %4650 = vmatmul.mubr.msk.f32.vlgmr.msra.gmra.mxu0 %vm397_vm1, %v5340_v40  ;;  %v5468_v15 = vsel %vm370_vm0, %v915_v12, %v916_v13  ;;  %v5693_v12 = vsel %vm370_vm0, %v1702_v3, %v1703_v4 }
  0x3f   : > { %4636 = vmatmul.mubr.msk.f32.vlgmr.msra.gmra.mxu1 %vm397_vm1, %v5297_v21  ;;  %4676 = vmatpush3.msra.mxu0 %v4151_v62  ;;  %v1699_v62 = vrot.slane %v5618_v53, 1 }
  0x40   : > { %4662 = vmatpush3.msra.mxu1 %v4142_v58  ;;  %4638 = vmatprep.mubr.msk.f32.mxu1 %vm397_vm1, %v5323_v33  ;;  %v1696_v58 = vrot.slane %v5612_v51, 1 }
  0x41   : > { %4652 = vmatprep.mubr.msk.f32.mxu0 %vm397_vm1, %v5357_v48  ;;  %4689 = vmatprep.subr.mxu1 %v4160_v8 }
  0x42   : > { %4653 = vmatmul.mubr.msk.f32.gmra.mxu0 %vm397_vm1, %v5301_v22  ;;  %4703 = vmatprep.subr.mxu0 %v4169_v9 }
  0x43   : > { %4639 = vmatmul.mubr.msk.f32.gmra.mxu1 %vm397_vm1, %v5275_v5  ;;  %4655 = vmatprep.mubr.msk.f32.mxu0 %vm397_vm1, %v5331_v35 }
  0x44   : > { %4641 = vmatprep.mubr.msk.f32.mxu1 %vm397_vm1, %v5288_v14 }
  0x46   : > { %4656 = vmatmul.mubr.msk.f32.gmra.mxu0 %vm397_vm1, %v5350_v45 }
  0x47   : > { %4642 = vmatmul.mubr.msk.f32.gmra.mxu1 %vm397_vm1, %v5308_v27  ;;  %4658 = vmatprep.mubr.msk.f32.mxu0 %vm397_vm1, %v5360_v49 }
  0x48   : > { %4644 = vmatprep.mubr.msk.f32.mxu1 %vm397_vm1, %v5326_v34 }
  0x4a   : > { %4659 = vmatmul.mubr.msk.f32.gmra.mxu0 %vm397_vm1, %v5468_v15 }
  0x4b   : > { %4645 = vmatmul.mubr.msk.f32.gmra.mxu1 %vm397_vm1, %v349_v10  ;;  %4677 = vmatprep.mubr.msk.f32.mxu0 %vm397_vm1, %v5297_v21  ;;  %v4205_v21 = vld [vmem:[%s6391_s3 + $0x60] sm:$0xff] }
  0x4c   : > { %4663 = vmatprep.mubr.msk.f32.mxu1 %vm397_vm1, %v5369_v52  ;;  %v5615_v52 = vld [vmem:[%s5523_s17 + $0x58] sm:$0x3] }
  0x4e   : > { %4678 = vmatmul.mubr.msk.f32.vlgmr.msra.gmra.mxu0 %vm397_vm1, %v5323_v33 }
  0x4f   : > { %4664 = vmatmul.mubr.msk.f32.vlgmr.msra.gmra.mxu1 %vm397_vm1, %v5379_v57  ;;  %4704 = vmatpush3.msra.mxu0 %v4169_v9 }
  0x50   : > { %4690 = vmatpush3.msra.mxu1 %v4160_v8  ;;  %4666 = vmatprep.mubr.msk.f32.mxu1 %vm397_vm1, %v5387_v59  ;;  %v1837_v8 = vrot.slane %v5545_v25, 2  ;;  %v1846_v25 = vrot.slane %v5588_v41, 2 }
  0x51   : > { %4680 = vmatprep.mubr.msk.f32.mxu0 %vm397_vm1, %v5275_v5  ;;  %4717 = vmatprep.subr.mxu1 %v4178_v16  ;;  %v351_v5 = vld [vmem:[%s5268_s14 + $0x90] sm:$0xff]  ;;  %s4974_s14 = smul.u32 20, %s6432_s10  ;;  %s3959_s10 = sadd.s32 %s4344_s8, %s4343_s27 }
  0x52   : > { %4681 = vmatmul.mubr.msk.f32.gmra.mxu0 %vm397_vm1, %v5288_v14  ;;  %4731 = vmatprep.subr.mxu0 %v4187_v17  ;;  %v1037_v14 = vsel %vm640_vm2, %v1035_v18, %v1036_v19  ;;  %v1394_v26 = vrot.slane %v351_v5, 2  ;;  %v1274_v28 = vrot.slane %v351_v5, 1  ;;  %s4345_s21 = sshll.u32 %s3959_s10, 7 }
  0x53   : > { %4667 = vmatmul.mubr.msk.f32.gmra.mxu1 %vm397_vm1, %v5397_v63  ;;  %4683 = vmatprep.mubr.msk.f32.mxu0 %vm397_vm1, %v5308_v27  ;;  %v5555_v27 = vld [vmem:[%s5523_s17 + $0x10] sm:$0xff]  ;;  %s329_s15 = sadd.s32 %s4974_s14, %s5262_s30  ;;  %s6329_s12 = scalar_lea.hbm %s6393_s5, %s4345_s21 }
  0x54   : > { %4669 = vmatprep.mubr.msk.f32.mxu1 %vm397_vm1, %v5410_v2  ;;  %v1276_v38 = vsel %vm370_vm0, %v1274_v28, %v1275_v29  ;;  %s4097_s30 = sshll.u32 %s329_s15, 3  ;;  %v1849_v28 = vrot.slane %v5594_v43, 2  ;;  %v4241_v29 = vld [vmem:[%s6391_s3 + $0x80] sm:$0xff] }
  0x55   : > { %s5677_s9 = scalar_lea.vmem %s6390_s2, %s4097_s30  ;;  %v1530_v43 = vld [vmem:[%s5523_s17 + $0x80] sm:$0xff] }
  0x56   : > { %4684 = vmatmul.mubr.msk.f32.gmra.mxu0 %vm397_vm1, %v5326_v34  ;;  %v1684_v34 = vrot.slane %v5555_v27, 1  ;;  %v5682_v9 = vld [vmem:[%s5677_s9 + $0x90] sm:$0xff]  ;;  %v2728_v13 = vld [vmem:[%s5677_s9 + $0x98] sm:$0x3]  ;;  %v5900_v3 = vld [vmem:[%s5677_s9 + $0x60] sm:$0xff] }
  0x57   : > { %4670 = vmatmul.mubr.msk.f32.gmra.mxu1 %vm397_vm1, %v5416_v6  ;;  %4686 = vmatprep.mubr.msk.f32.mxu0 %vm397_vm1, %v349_v10  ;;  %v3664_v10 = vrot.slane %v5682_v9, 1  ;;  %v3784_v11 = vrot.slane %v5682_v9, 2  ;;  %v3785_v18 = vrot.slane %v2728_v13, 2 }
  0x58   : > { %4672 = vmatprep.mubr.msk.f32.mxu1 %vm397_vm1, %v5425_v7 }
  0x5a   : > { %4687 = vmatmul.mubr.msk.f32.gmra.mxu0 %vm397_vm1, %v351_v5  ;;  %v1842_v5 = vrot.slane %v5575_v36, 2 }
  0x5b   : > { %4673 = vmatmul.mubr.msk.f32.gmra.mxu1 %vm397_vm1, %v1037_v14  ;;  %4705 = vmatprep.mubr.msk.f32.mxu0 %vm397_vm1, %v5379_v57 }
  0x5c   : > { %4691 = vmatprep.mubr.msk.f32.mxu1 %vm397_vm1, %v5340_v40  ;;  %v5585_v40 = vld [vmem:[%s5523_s17 + $0x30] sm:$0xff] }
  0x5d   : > { %v1690_v47 = vrot.slane %v5585_v40, 1 }
  0x5e   : > { %4706 = vmatmul.mubr.msk.f32.vlgmr.msra.gmra.mxu0 %vm397_vm1, %v5387_v59  ;;  %v1697_v59 = vrot.slane %v5615_v52, 1 }
  0x5f   : > { %4692 = vmatmul.mubr.msk.f32.vlgmr.msra.gmra.mxu1 %vm397_vm1, %v5357_v48  ;;  %4732 = vmatpush3.msra.mxu0 %v4187_v17  ;;  %v1691_v48 = vrot.slane %v5588_v41, 1  ;;  %v3665_v17 = vrot.slane %v2728_v13, 1  ;;  %v2714_v13 = vld [vmem:[%s5677_s9 + $0x28] sm:$0x3] }
  0x60   : > { %4718 = vmatpush3.msra.mxu1 %v4178_v16  ;;  %4694 = vmatprep.mubr.msk.f32.mxu1 %vm397_vm1, %v5301_v22  ;;  %v1395_v22 = vrot.slane %v352_v23, 2  ;;  %v1840_v16 = vrot.slane %v5562_v32, 2 }
  0x61   : > { %4708 = vmatprep.mubr.msk.f32.mxu0 %vm397_vm1, %v5397_v63  ;;  %4745 = vmatprep.subr.mxu1 %v5528_v20  ;;  %v5635_v57 = vsel %vm370_vm0, %v1690_v47, %v1691_v48  ;;  %v1700_v63 = vrot.slane %v5621_v54, 1  ;;  %v4259_v47 = vld [vmem:[%s6391_s3 + $0x90] sm:$0xff]  ;;  %v2230_v48 = vrot.slane %v1530_v43, 2 }
  0x62   : > { %4709 = vmatmul.mubr.msk.f32.gmra.mxu0 %vm397_vm1, %v5410_v2  ;;  %4759 = vmatprep.subr.mxu0 %v4205_v21  ;;  %v1396_v33 = vsel %vm640_vm2, %v1394_v26, %v1395_v22  ;;  %v5665_v2 = vsel %vm370_vm0, %v1696_v58, %v1697_v59  ;;  %v1848_v22 = vrot.slane %v5591_v42, 2  ;;  %v4268_v58 = vld [vmem:[%s6391_s3 + $0x98] sm:$0xff]  ;;  %v4277_v59 = vld [vmem:[%s6391_s3 + $0xa0] sm:$0xff] }
  0x63   : > { %4695 = vmatmul.mubr.msk.f32.gmra.mxu1 %vm397_vm1, %v5331_v35  ;;  %4711 = vmatprep.mubr.msk.f32.mxu0 %vm397_vm1, %v5416_v6  ;;  %v1685_v35 = vrot.slane %v5562_v32, 1  ;;  %v5672_v6 = vsel %vm370_vm0, %v1699_v62, %v1700_v63  ;;  %v1852_v32 = vrot.slane %v5615_v52, 2  ;;  %v5876_v62 = vld [vmem:[%s5677_s9 + $0x30] sm:$0xff] }
  0x64   : > { %4697 = vmatprep.mubr.msk.f32.mxu1 %vm397_vm1, %v5350_v45  ;;  %v1688_v45 = vrot.slane %v5578_v37, 1  ;;  %v4295_v63 = vld [vmem:[%s6391_s3 + $0xb0] sm:$0xff] }
  0x65   : > { %v5603_v46 = vsel %vm370_vm0, %v1684_v34, %v1685_v35  ;;  %v1854_v34 = vrot.slane %v5618_v53, 2  ;;  %v1855_v35 = vrot.slane %v5621_v54, 2 }
  0x66   : > { %4712 = vmatmul.mubr.msk.f32.gmra.mxu0 %vm397_vm1, %v5425_v7  ;;  %v5626_v55 = vsel %vm370_vm0, %v1687_v44, %v1688_v45  ;;  %v1836_v7 = vrot.slane %v5542_v24, 2  ;;  %v4250_v45 = vld [vmem:[%s6391_s3 + $0x88] sm:$0xff] }
  0x67   : > { %4698 = vmatmul.mubr.msk.f32.gmra.mxu1 %vm397_vm1, %v5360_v49  ;;  %4714 = vmatprep.mubr.msk.f32.mxu0 %vm397_vm1, %v1037_v14  ;;  %v1693_v49 = vrot.slane %v5591_v42, 1  ;;  %v1843_v14 = vrot.slane %v5578_v37, 2  ;;  %v5756_v37 = vsel %vm640_vm2, %v1851_v31, %v1852_v32  ;;  %v5761_v41 = vsel %vm640_vm2, %v1854_v34, %v1855_v35 }
  0x68   : > { %4700 = vmatprep.mubr.msk.f32.mxu1 %vm397_vm1, %v5468_v15  ;;  %v1839_v15 = vrot.slane %v5555_v27, 2  ;;  %v1838_v19 = vsel %vm640_vm2, %v1836_v7, %v1837_v8  ;;  %v3040_v32 = vrot.slane %v5876_v62, 2 }
  0x69   : > { %v5646_v61 = vsel %vm370_vm0, %v1693_v49, %v1694_v50  ;;  %v5720_v26 = vsel %vm640_vm2, %v1842_v5, %v1843_v14  ;;  %v2110_v50 = vrot.slane %v1530_v43, 1 }
  0x6a   : > { %4715 = vmatmul.mubr.msk.f32.gmra.mxu0 %vm397_vm1, %v1396_v33  ;;  %v1841_v23 = vsel %vm640_vm2, %v1839_v15, %v1840_v16  ;;  %v5743_v33 = vsel %vm640_vm2, %v1848_v22, %v1849_v28  ;;  %v5914_v16 = vld [vmem:[%s5677_s9 + $0x70] sm:$0xff]  ;;  %v2718_v22 = vld [vmem:[%s5677_s9 + $0x48] sm:$0x3] }
  0x6b   : > { %4701 = vmatmul.mubr.msk.f32.gmra.mxu1 %vm397_vm1, %v1276_v38  ;;  %4733 = vmatprep.mubr.msk.f32.mxu0 %vm397_vm1, %v1683_v39  ;;  %v1857_v38 = vrot.slane %v5651_v0, 2  ;;  %v1858_v39 = vrot.slane %v5654_v1, 2  ;;  %v2710_v1 = vld [vmem:[%s5677_s9 + $0x8] sm:$0x3] }
  0x6c   : > { %4719 = vmatprep.mubr.msk.f32.mxu1 %vm397_vm1, %v5542_v24  ;;  %v1845_v24 = vrot.slane %v5585_v40, 2  ;;  %v3032_v8 = vrot.slane %v2710_v1, 2 }
  0x6d   : > { %v5773_v44 = vsel %vm640_vm2, %v1857_v38, %v1858_v39  ;;  %v2720_v38 = vld [vmem:[%s5677_s9 + $0x58] sm:$0x3] }
  0x6e   : > { %4734 = vmatmul.mubr.msk.f32.vlgmr.msra.gmra.mxu0 %vm397_vm1, %v5603_v46  ;;  %v5736_v30 = vsel %vm640_vm2, %v1845_v24, %v1846_v25 }
  0x6f   : > { %4720 = vmatmul.mubr.msk.f32.vlgmr.msra.gmra.mxu1 %vm397_vm1, %v5555_v27  ;;  %4760 = vmatpush3.msra.mxu0 %v4205_v21  ;;  %v5709_v21 = vsel %vm640_vm2, %v3784_v11, %v3785_v18  ;;  %v2716_v18 = vld [vmem:[%s5677_s9 + $0x38] sm:$0x3] }
  0x70   : > { %4746 = vmatpush3.msra.mxu1 %v5528_v20  ;;  %4722 = vmatprep.mubr.msk.f32.mxu1 %vm397_vm1, %v5575_v36  ;;  %v5706_v20 = vsel %vm370_vm0, %v3664_v10, %v3665_v17  ;;  %v2712_v10 = vld [vmem:[%s5677_s9 + $0x18] sm:$0x3] }
  0x71   : > { %4736 = vmatprep.mubr.msk.f32.mxu0 %vm397_vm1, %v5626_v55  ;;  %4773 = vmatprep.subr.mxu1 %v4214_v56  ;;  %v3035_v17 = vrot.slane %v2712_v10, 2 }
  0x72   : > { %4737 = vmatmul.mubr.msk.f32.gmra.mxu0 %vm397_vm1, %v5635_v57  ;;  %4787 = vmatprep.subr.mxu0 %v4223_v60 }
  0x73   : > { %4723 = vmatmul.mubr.msk.f32.gmra.mxu1 %vm397_vm1, %v5585_v40  ;;  %4739 = vmatprep.mubr.msk.f32.mxu0 %vm397_vm1, %v5646_v61 }
  0x74   : > { %4725 = vmatprep.mubr.msk.f32.mxu1 %vm397_vm1, %v5591_v42 }
  0x76   : > { %4740 = vmatmul.mubr.msk.f32.gmra.mxu0 %vm397_vm1, %v5665_v2 }
  0x77   : > { %4726 = vmatmul.mubr.msk.f32.gmra.mxu1 %vm397_vm1, %v5612_v51  ;;  %4742 = vmatprep.mubr.msk.f32.mxu0 %vm397_vm1, %v5672_v6 }
  0x78   : > { %4728 = vmatprep.mubr.msk.f32.mxu1 %vm397_vm1, %v5618_v53 }
  0x7a   : > { %4743 = vmatmul.mubr.msk.f32.gmra.mxu0 %vm397_vm1, %v5693_v12 }
  0x7b   : > { %4729 = vmatmul.mubr.msk.f32.gmra.mxu1 %vm397_vm1, %v5651_v0  ;;  %4761 = vmatprep.mubr.msk.f32.mxu0 %vm397_vm1, %v5555_v27  ;;  %v4232_v27 = vld [vmem:[%s6391_s3 + $0x78] sm:$0xff] }
  0x7c   : > { %4747 = vmatprep.mubr.msk.f32.mxu1 %vm397_vm1, %v1838_v19 }
  0x7e   : > { %4762 = vmatmul.mubr.msk.f32.vlgmr.msra.gmra.mxu0 %vm397_vm1, %v5575_v36 }
  0x7f   : > { %4748 = vmatmul.mubr.msk.f32.vlgmr.msra.gmra.mxu1 %vm397_vm1, %v1841_v23  ;;  %4788 = vmatpush3.msra.mxu0 %v4223_v60  ;;  %v5866_v60 = vld [vmem:[%s5677_s9 + $0x20] sm:$0xff] }
  0x80   : > { %4774 = vmatpush3.msra.mxu1 %v4214_v56  ;;  %4750 = vmatprep.mubr.msk.f32.mxu1 %vm397_vm1, %v5720_v26  ;;  %v2882_v25 = vrot.slane %v5866_v60, 1  ;;  %v3037_v28 = vrot.slane %v5866_v60, 2 }
  0x81   : > { %4764 = vmatprep.mubr.msk.f32.mxu0 %vm397_vm1, %v5585_v40  ;;  %4801 = vmatprep.subr.mxu1 %v4232_v27 }
  0x82   : > { %4765 = vmatmul.mubr.msk.f32.gmra.mxu0 %vm397_vm1, %v5591_v42  ;;  %4815 = vmatprep.subr.mxu0 %v4241_v29 }
  0x83   : > { %4751 = vmatmul.mubr.msk.f32.gmra.mxu1 %vm397_vm1, %v5736_v30  ;;  %4767 = vmatprep.mubr.msk.f32.mxu0 %vm397_vm1, %v5612_v51 }
  0x84   : > { %4753 = vmatprep.mubr.msk.f32.mxu1 %vm397_vm1, %v5743_v33 }
  0x86   : > { %4768 = vmatmul.mubr.msk.f32.gmra.mxu0 %vm397_vm1, %v5618_v53 }
  0x87   : > { %4754 = vmatmul.mubr.msk.f32.gmra.mxu1 %vm397_vm1, %v5756_v37  ;;  %4770 = vmatprep.mubr.msk.f32.mxu0 %vm397_vm1, %v5651_v0 }
  0x88   : > { %4756 = vmatprep.mubr.msk.f32.mxu1 %vm397_vm1, %v5761_v41 }
  0x8a   : > { %4771 = vmatmul.mubr.msk.f32.gmra.mxu0 %vm397_vm1, %v1530_v43 }
  0x8b   : > { %4757 = vmatmul.mubr.msk.f32.gmra.mxu1 %vm397_vm1, %v5773_v44  ;;  %4789 = vmatprep.mubr.msk.f32.mxu0 %vm397_vm1, %v1841_v23  ;;  %v2880_v23 = vrot.slane %v2712_v10, 1 }
  0x8c   : > { %4775 = vmatprep.mubr.msk.f32.mxu1 %vm397_vm1, %v5603_v46  ;;  %v1531_v46 = vld [vmem:[%s5523_s17 + $0x88] sm:$0x3] }
  0x8d   : > { %v2231_v49 = vrot.slane %v1531_v46, 2  ;;  %v2111_v52 = vrot.slane %v1531_v46, 1  ;;  %v4304_v46 = vld [vmem:[%s6391_s3 + $0xb8] sm:$0xff] }
  0x8e   : > { %4790 = vmatmul.mubr.msk.f32.vlgmr.msra.gmra.mxu0 %vm397_vm1, %v5720_v26 }
  0x8f   : > { %4776 = vmatmul.mubr.msk.f32.vlgmr.msra.gmra.mxu1 %vm397_vm1, %v5626_v55  ;;  %4816 = vmatpush3.msra.mxu0 %v4241_v29  ;;  %v5811_v54 = vsel %vm640_vm2, %v2230_v48, %v2231_v49  ;;  %v2112_v56 = vsel %vm370_vm0, %v2110_v50, %v2111_v52  ;;  %v2885_v29 = vrot.slane %v5876_v62, 1  ;;  %v3047_v52 = vrot.slane %v2720_v38, 2 }
  0x90   : > { %4802 = vmatpush3.msra.mxu1 %v4232_v27  ;;  %4778 = vmatprep.mubr.msk.f32.mxu1 %vm397_vm1, %v5635_v57  ;;  %v3038_v27 = vrot.slane %v2714_v13, 2 }
  0x91   : > { %4792 = vmatprep.mubr.msk.f32.mxu0 %vm397_vm1, %v5736_v30  ;;  %4829 = vmatprep.subr.mxu1 %v4250_v45 }
  0x92   : > { %4793 = vmatmul.mubr.msk.f32.gmra.mxu0 %vm397_vm1, %v5743_v33  ;;  %4843 = vmatprep.subr.mxu0 %v4259_v47 }
  0x93   : > { %4779 = vmatmul.mubr.msk.f32.gmra.mxu1 %vm397_vm1, %v5646_v61  ;;  %4795 = vmatprep.mubr.msk.f32.mxu0 %vm397_vm1, %v5756_v37 }
  0x94   : > { %4781 = vmatprep.mubr.msk.f32.mxu1 %vm397_vm1, %v5665_v2 }
  0x96   : > { %4796 = vmatmul.mubr.msk.f32.gmra.mxu0 %vm397_vm1, %v5761_v41 }
  0x97   : > { %4782 = vmatmul.mubr.msk.f32.gmra.mxu1 %vm397_vm1, %v5672_v6  ;;  %4798 = vmatprep.mubr.msk.f32.mxu0 %vm397_vm1, %v5773_v44 }
  0x98   : > { %4784 = vmatprep.mubr.msk.f32.mxu1 %vm397_vm1, %v5693_v12 }
  0x9a   : > { %4799 = vmatmul.mubr.msk.f32.gmra.mxu0 %vm397_vm1, %v5811_v54 }
  0x9b   : > { %4785 = vmatmul.mubr.msk.f32.gmra.mxu1 %vm397_vm1, %v2112_v56  ;;  %4817 = vmatprep.mubr.msk.f32.mxu0 %vm397_vm1, %v5626_v55  ;;  %v1533_v55 = vld [vmem:[%s5523_s17 + $0x98] sm:$0x3] }
  0x9c   : > { %4803 = vmatprep.mubr.msk.f32.mxu1 %vm397_vm1, %v5575_v36  ;;  %v1532_v36 = vld [vmem:[%s5523_s17 + $0x90] sm:$0xff]  ;;  %v2590_v7 = vrot.slane %v1533_v55, 2 }
  0x9d   : > { %v2589_v4 = vrot.slane %v1532_v36, 2 }
  0x9e   : > { %4818 = vmatmul.mubr.msk.f32.vlgmr.msra.gmra.mxu0 %vm397_vm1, %v5635_v57  ;;  %v2709_v57 = vld [vmem:[%s5677_s9] sm:$0xff] }
  0x9f   : > { %4804 = vmatmul.mubr.msk.f32.vlgmr.msra.gmra.mxu1 %vm397_vm1, %v5585_v40  ;;  %4844 = vmatpush3.msra.mxu0 %v4259_v47  ;;  %v2469_v40 = vrot.slane %v1532_v36, 1  ;;  %v2876_v11 = vrot.slane %v2709_v57, 1  ;;  %v2591_v5 = vsel %vm640_vm2, %v2589_v4, %v2590_v7 }
  0xa0   : > { %4830 = vmatpush3.msra.mxu1 %v4250_v45  ;;  %4806 = vmatprep.mubr.msk.f32.mxu1 %vm397_vm1, %v5591_v42  ;;  %v2470_v42 = vrot.slane %v1533_v55, 1  ;;  %v5947_v45 = vsel %vm640_vm2, %v3037_v28, %v3038_v27  ;;  %v2724_v55 = vld [vmem:[%s5677_s9 + $0x78] sm:$0x3] }
  0xa1   : > { %4820 = vmatprep.mubr.msk.f32.mxu0 %vm397_vm1, %v5646_v61  ;;  %4857 = vmatprep.subr.mxu1 %v4268_v58  ;;  %v5871_v61 = vld [vmem:[%s6391_s3 + $0xa8] sm:$0xff]  ;;  %v2898_v7 = vrot.slane %v2724_v55, 1 }
  0xa2   : > { %4821 = vmatmul.mubr.msk.f32.gmra.mxu0 %vm397_vm1, %v5665_v2  ;;  %4871 = vmatprep.subr.mxu0 %v4277_v59  ;;  %v5897_v2 = vld [vmem:[%s5677_s9 + $0x50] sm:$0xff] }
  0xa3   : > { %4807 = vmatmul.mubr.msk.f32.gmra.mxu1 %vm397_vm1, %v5612_v51  ;;  %4823 = vmatprep.mubr.msk.f32.mxu0 %vm397_vm1, %v5672_v6  ;;  %v2471_v51 = vsel %vm370_vm0, %v2469_v40, %v2470_v42  ;;  %v3031_v6 = vrot.slane %v2709_v57, 2  ;;  %v2891_v49 = vrot.slane %v5897_v2, 1  ;;  %v3046_v50 = vrot.slane %v5897_v2, 2 }
  0xa4   : > { %4809 = vmatprep.mubr.msk.f32.mxu1 %vm397_vm1, %v5618_v53  ;;  %v5859_v53 = vld [vmem:[%s5677_s9 + $0x10] sm:$0xff]  ;;  %v2894_v42 = vrot.slane %v5900_v3, 1 }
  0xa5   : > { %v3034_v15 = vrot.slane %v5859_v53, 2  ;;  %v2879_v19 = vrot.slane %v5859_v53, 1  ;;  %v3033_v14 = vsel %vm640_vm2, %v3031_v6, %v3032_v8  ;;  %v2897_v6 = vrot.slane %v5914_v16, 1 }
  0xa6   : > { %4824 = vmatmul.mubr.msk.f32.gmra.mxu0 %vm397_vm1, %v5693_v12  ;;  %v2877_v12 = vrot.slane %v2710_v1, 1 }
  0xa7   : > { %4810 = vmatmul.mubr.msk.f32.gmra.mxu1 %vm397_vm1, %v5651_v0  ;;  %4826 = vmatprep.mubr.msk.f32.mxu0 %vm397_vm1, %v2112_v56  ;;  %v5884_v0 = vld [vmem:[%s5677_s9 + $0x40] sm:$0xff]  ;;  %v5932_v31 = vsel %vm640_vm2, %v3034_v15, %v3035_v17  ;;  %v2881_v34 = vsel %vm370_vm0, %v2879_v19, %v2880_v23  ;;  %v2726_v15 = vld [vmem:[%s5677_s9 + $0x88] sm:$0x3] }
  0xa8   : > { %4812 = vmatprep.mubr.msk.f32.mxu1 %vm397_vm1, %v1530_v43  ;;  %v2878_v24 = vsel %vm370_vm0, %v2876_v11, %v2877_v12  ;;  %v3043_v35 = vrot.slane %v5884_v0, 2  ;;  %v2889_v43 = vrot.slane %v2718_v22, 1  ;;  %v6012_v11 = vsel %vm370_vm0, %v2897_v6, %v2898_v7  ;;  %v4322_v12 = vld [vmem:[%s6391_s3 + $0xc8] sm:$0xff] }
  0xaa   : > { %4827 = vmatmul.mubr.msk.f32.gmra.mxu0 %vm397_vm1, %v2471_v51 }
  0xab   : > { %4813 = vmatmul.mubr.msk.f32.gmra.mxu1 %vm397_vm1, %v1532_v36  ;;  %4845 = vmatprep.mubr.msk.f32.mxu0 %vm397_vm1, %v2709_v57  ;;  %v5985_v57 = vsel %vm640_vm2, %v3046_v50, %v3047_v52 }
  0xac   : > { %4831 = vmatprep.mubr.msk.f32.mxu1 %vm397_vm1, %v5720_v26  ;;  %v2883_v26 = vrot.slane %v2714_v13, 1  ;;  %v4331_v13 = vld [vmem:[%s6391_s3 + $0xd0] sm:$0xff] }
  0xae   : > { %4846 = vmatmul.mubr.msk.f32.vlgmr.msra.gmra.mxu0 %vm397_vm1, %v5859_v53  ;;  %v5940_v39 = vsel %vm370_vm0, %v2882_v25, %v2883_v26 }
  0xaf   : > { %4832 = vmatmul.mubr.msk.f32.vlgmr.msra.gmra.mxu1 %vm397_vm1, %v5736_v30  ;;  %4872 = vmatpush3.msra.mxu0 %v4277_v59  ;;  %v2886_v30 = vrot.slane %v2716_v18, 1  ;;  %v3049_v59 = vrot.slane %v5900_v3, 2 }
  0xb0   : > { %4858 = vmatpush3.msra.mxu1 %v4268_v58  ;;  %4834 = vmatprep.mubr.msk.f32.mxu1 %vm397_vm1, %v5743_v33  ;;  %v3041_v33 = vrot.slane %v2716_v18, 2  ;;  %v2892_v58 = vrot.slane %v2720_v38, 1  ;;  %v3306_v18 = vrot.slane %v2726_v15, 1 }
  0xb1   : > { %4848 = vmatprep.mubr.msk.f32.mxu0 %vm397_vm1, %v5866_v60  ;;  %4885 = vmatprep.subr.mxu1 %v5871_v61  ;;  %v5950_v47 = vsel %vm370_vm0, %v2885_v29, %v2886_v30 }
  0xb2   : > { %4849 = vmatmul.mubr.msk.f32.gmra.mxu0 %vm397_vm1, %v5876_v62  ;;  %4899 = vmatprep.subr.mxu0 %v4295_v63  ;;  %v5957_v48 = vsel %vm640_vm2, %v3040_v32, %v3041_v33  ;;  %v5991_v1 = vsel %vm370_vm0, %v2891_v49, %v2892_v58 }
  0xb3   : > { %4835 = vmatmul.mubr.msk.f32.gmra.mxu1 %vm397_vm1, %v5756_v37  ;;  %4851 = vmatprep.mubr.msk.f32.mxu0 %vm397_vm1, %v5884_v0  ;;  %v3044_v37 = vrot.slane %v2718_v22, 2 }
  0xb4   : > { %4837 = vmatprep.mubr.msk.f32.mxu1 %vm397_vm1, %v5761_v41  ;;  %v2888_v41 = vrot.slane %v5884_v0, 1 }
  0xb5   : > { %v5968_v56 = vsel %vm640_vm2, %v3043_v35, %v3044_v37 }
  0xb6   : > { %4852 = vmatmul.mubr.msk.f32.gmra.mxu0 %vm397_vm1, %v5897_v2  ;;  %v5975_v40 = vsel %vm370_vm0, %v2888_v41, %v2889_v43 }
  0xb7   : > { %4838 = vmatmul.mubr.msk.f32.gmra.mxu1 %vm397_vm1, %v5773_v44  ;;  %4854 = vmatprep.mubr.msk.f32.mxu0 %vm397_vm1, %v5900_v3  ;;  %v2722_v44 = vld [vmem:[%s5677_s9 + $0x68] sm:$0x3] }
  0xb8   : > { %4840 = vmatprep.mubr.msk.f32.mxu1 %vm397_vm1, %v5811_v54  ;;  %v4313_v54 = vld [vmem:[%s6391_s3 + $0xc0] sm:$0xff]  ;;  %v3050_v36 = vrot.slane %v2722_v44, 2  ;;  %v2895_v51 = vrot.slane %v2722_v44, 1 }
  0xba   : > { %4855 = vmatmul.mubr.msk.f32.gmra.mxu0 %vm397_vm1, %v5914_v16  ;;  %v5994_v4 = vsel %vm640_vm2, %v3049_v59, %v3050_v36  ;;  %v5998_v8 = vsel %vm370_vm0, %v2894_v42, %v2895_v51 }
  0xbb   : > { %4841 = vmatmul.mubr.msk.f32.gmra.mxu1 %vm397_vm1, %v2591_v5  ;;  %4873 = vmatprep.mubr.msk.f32.mxu0 %vm397_vm1, %v3033_v14 }
  0xbc   : > { %4859 = vmatprep.mubr.msk.f32.mxu1 %vm397_vm1, %v2878_v24 }
  0xbe   : > { %4874 = vmatmul.mubr.msk.f32.vlgmr.msra.gmra.mxu0 %vm397_vm1, %v5932_v31 }
  0xbf   : > { %4860 = vmatmul.mubr.msk.f32.vlgmr.msra.gmra.mxu1 %vm397_vm1, %v2881_v34  ;;  %4900 = vmatpush3.msra.mxu0 %v4295_v63  ;;  %v3053_v63 = vrot.slane %v2724_v55, 2 }
  0xc0   : > { %4886 = vmatpush3.msra.mxu1 %v5871_v61  ;;  %4862 = vmatprep.mubr.msk.f32.mxu1 %vm397_vm1, %v5940_v39  ;;  %v3052_v61 = vrot.slane %v5914_v16, 2 }
  0xc1   : > { %4876 = vmatprep.mubr.msk.f32.mxu0 %vm397_vm1, %v5947_v45  ;;  %4913 = vmatprep.subr.mxu1 %v4304_v46 }
  0xc2   : > { %4877 = vmatmul.mubr.msk.f32.gmra.mxu0 %vm397_vm1, %v5957_v48  ;;  %4927 = vmatprep.subr.mxu0 %v4313_v54  ;;  %v6007_v10 = vsel %vm640_vm2, %v3052_v61, %v3053_v63 }
  0xc3   : > { %4863 = vmatmul.mubr.msk.f32.gmra.mxu1 %vm397_vm1, %v5950_v47  ;;  %4879 = vmatprep.mubr.msk.f32.mxu0 %vm397_vm1, %v5968_v56 }
  0xc4   : > { %4865 = vmatprep.mubr.msk.f32.mxu1 %vm397_vm1, %v5975_v40 }
  0xc6   : > { %4880 = vmatmul.mubr.msk.f32.gmra.mxu0 %vm397_vm1, %v5985_v57 }
  0xc7   : > { %4866 = vmatmul.mubr.msk.f32.gmra.mxu1 %vm397_vm1, %v5991_v1  ;;  %4882 = vmatprep.mubr.msk.f32.mxu0 %vm397_vm1, %v5994_v4 }
  0xc8   : > { %4868 = vmatprep.mubr.msk.f32.mxu1 %vm397_vm1, %v5998_v8 }
  0xca   : > { %4883 = vmatmul.mubr.msk.f32.gmra.mxu0 %vm397_vm1, %v6007_v10 }
  0xcb   : > { %4869 = vmatmul.mubr.msk.f32.gmra.mxu1 %vm397_vm1, %v6012_v11  ;;  %4901 = vmatprep.mubr.msk.f32.mxu0 %vm397_vm1, %v2881_v34 }
  0xcc   : > { %4887 = vmatprep.mubr.msk.f32.mxu1 %vm397_vm1, %v5859_v53  ;;  %v2725_v53 = vld [vmem:[%s5677_s9 + $0x80] sm:$0xff]  ;;  %s299_s9 = sand.u32 1, %s5116_s19  }
  0xcd   : > { %v3305_v17 = vrot.slane %v2725_v53, 1  ;;  %s4094_s26 = sshll.u32 %s299_s9, 6  ;;  %s6337_s13 = scalar_lea.sflag [#allocation3], %s299_s9 }
  0xce   : > { %4902 = vmatmul.mubr.msk.f32.vlgmr.msra.gmra.mxu0 %vm397_vm1, %v5940_v39  ;;  %s6303_s30 = scalar_lea.vmem [#allocation2], %s4094_s26  ;;  %s5052_s26 = sshll.u32 %s5142_s16, 4  ;;  %s5053_s26 = int_to_ptr.vmem [resolvable:$false] %s5052_s26 }
  0xcf   : > { %4888 = vmatmul.mubr.msk.f32.vlgmr.msra.gmra.mxu1 %vm397_vm1, %v5866_v60  ;;  %4928 = vmatpush3.msra.mxu0 %v4313_v54  ;;  %v6052_v19 = vsel %vm370_vm0, %v3305_v17, %v3306_v18  ;;  %s3962_s22 = sshll.u32 %s6303_s30, 4  ;;  %s5054_s27 = scalar_lea.vmem %s5053_s26, 2048  ;;  %s6331_s22 = int_to_ptr.vmem [resolvable:$true] %s3962_s22 }
  0xd0   : > { %4914 = vmatpush3.msra.mxu1 %v4304_v46  ;;  %4890 = vmatprep.mubr.msk.f32.mxu1 %vm397_vm1, %v5876_v62  ;;  %s5048_s15 = scalar_lea.vmem %s6331_s22, 1024  ;;  %p5055_p6 = scmp.lt.s32.totalorder %s6331_s22, %s5053_s26 }
  0xd1   : > { %4904 = vmatprep.mubr.msk.f32.mxu0 %vm397_vm1, %v5950_v47  ;;  %4941 = vmatprep.subr.mxu1 %v4322_v12  ;;  %p5049_p2 = scmp.ne.s32.totalorder %s6331_s22, %s5048_s15  ;;  %p5056_p7 = scmp.lt.s32.totalorder %s5054_s27, %s5048_s15 }
  0xd2   : > { %4905 = vmatmul.mubr.msk.f32.gmra.mxu0 %vm397_vm1, %v5975_v40  ;;  %4955 = vmatprep.subr.mxu0 %v4331_v13 }
  0xd3   : > { %4891 = vmatmul.mubr.msk.f32.gmra.mxu1 %vm397_vm1, %v5884_v0  ;;  %4907 = vmatprep.mubr.msk.f32.mxu0 %vm397_vm1, %v5991_v1  ;;  %p5050_p4 = pnand %p5049_p2, %p5226_p3  ;;  %p5057_p9 = por %p5056_p7, %p5055_p6 }
  0xd4   : > { %4893 = vmatprep.mubr.msk.f32.mxu1 %vm397_vm1, %v5897_v2 }
  0xd5   : > { %p5051_p5 = pneg %p5050_p4 }
  0xd6   : > { %4908 = vmatmul.mubr.msk.f32.gmra.mxu0 %vm397_vm1, %v5998_v8 }
  0xd7   : > { %4894 = vmatmul.mubr.msk.f32.gmra.mxu1 %vm397_vm1, %v5900_v3  ;;  %4910 = vmatprep.mubr.msk.f32.mxu0 %vm397_vm1, %v6012_v11  ;;  %p5058_p10 = pnand %p5057_p9, %p5051_p5 }
  0xd8   : > { %4896 = vmatprep.mubr.msk.f32.mxu1 %vm397_vm1, %v5914_v16 }
  0xda   : > { %4911 = vmatmul.mubr.msk.f32.gmra.mxu0 %vm397_vm1, %v6052_v19 }
  0xdb   : > { %4897 = vmatmul.mubr.msk.f32.gmra.mxu1 %vm397_vm1, %v2725_v53  ;;  %4929 = vmatprep.mubr.msk.f32.mxu0 %vm397_vm1, %v5866_v60  ;;  %v3425_v60 = vrot.slane %v2725_v53, 2 }
  0xdc   : > { %4915 = vmatprep.mubr.msk.f32.mxu1 %vm397_vm1, %v5932_v31 }
  0xde   : > { %4930 = vmatmul.mubr.msk.f32.vlgmr.msra.gmra.mxu0 %vm397_vm1, %v5876_v62  ;;  %v3426_v62 = vrot.slane %v2726_v15, 2 }
  0xdf   : > { %4916 = vmatmul.mubr.msk.f32.vlgmr.msra.gmra.mxu1 %vm397_vm1, %v5947_v45  ;;  %4956 = vmatpush3.msra.mxu0 %v4331_v13 }
  0xe0   : > { %4942 = vmatpush3.msra.mxu1 %v4322_v12  ;;  %4918 = vmatprep.mubr.msk.f32.mxu1 %vm397_vm1, %v5957_v48 }
  0xe1   : > { %4932 = vmatprep.mubr.msk.f32.mxu0 %vm397_vm1, %v5884_v0 }
  0xe2   : > { %4933 = vmatmul.mubr.msk.f32.gmra.mxu0 %vm397_vm1, %v5897_v2  ;;  %v3427_v2 = vsel %vm640_vm2, %v3425_v60, %v3426_v62 }
  0xe3   : > { %4919 = vmatmul.mubr.msk.f32.gmra.mxu1 %vm397_vm1, %v5968_v56  ;;  %4935 = vmatprep.mubr.msk.f32.mxu0 %vm397_vm1, %v5900_v3 }
  0xe4   : > { %4921 = vmatprep.mubr.msk.f32.mxu1 %vm397_vm1, %v5985_v57 }
  0xe6   : > { %v4595_v5 = vpop.f32.mrf.mxu0  ;;  %4936 = vmatmul.mubr.msk.f32.gmra.mxu0 %vm397_vm1, %v5914_v16 }
  0xe7   : > { %v4601_v14 = vpop.f32.mrf.mxu1  ;;  %4922 = vmatmul.mubr.msk.f32.gmra.mxu1 %vm397_vm1, %v5994_v4  ;;  %4938 = vmatprep.mubr.msk.f32.mxu0 %vm397_vm1, %v2725_v53 }
  0xe8   : > { %v480_v0 = vpop.f32.mrf.mxu0  ;;  %4924 = vmatprep.mubr.msk.f32.mxu1 %vm397_vm1, %v6007_v10 }
  0xe9   : > { %v500_v3 = vpop.f32.mrf.mxu1 }
  0xea   : > { %v4598_v23 = vpop.f32.mrf.mxu0  ;;  %4939 = vmatmul.mubr.msk.f32.gmra.mxu0 %vm397_vm1, %v5682_v9 }
  0xeb   : > { %v4604_v24 = vpop.f32.mrf.mxu1  ;;  %4925 = vmatmul.mubr.msk.f32.gmra.mxu1 %vm397_vm1, %v3427_v2  ;;  %4957 = vmatprep.mubr.msk.f32.mxu0 %vm397_vm1, %v5947_v45 }
  0xec   : > { %v490_v16 = vpop.f32.mrf.mxu0  ;;  %4943 = vmatprep.mubr.msk.f32.mxu1 %vm397_vm1, %v5940_v39 }
  0xed   : > { %v510_v25 = vpop.f32.mrf.mxu1 }
  0xee   : > { %v4623_v26 = vpop.f32.mrf.mxu0  ;;  %4958 = vmatmul.mubr.msk.f32.vlgmr.msra.gmra.mxu0 %vm397_vm1, %v5957_v48 }
  0xef   : > { %v4609_v22 = vpop.f32.mrf.mxu1  ;;  %4944 = vmatmul.mubr.msk.f32.vlgmr.msra.gmra.mxu1 %vm397_vm1, %v5950_v47  ;;  %4960 = vmatprep.mubr.msk.f32.mxu0 %vm397_vm1, %v5968_v56 }
  0xf0   : > { %v607_v9 = vadd.f32 %v4609_v22, %v4595_v5  ;;  %v749_v28 = vpop.f32.mrf.mxu0  ;;  %4946 = vmatprep.mubr.msk.f32.mxu1 %vm397_vm1, %v5975_v40 }
  0xf1   : > { %v601_v27 = vpop.f32.mrf.mxu1 }
  0xf2   : > { %v789_v29 = vadd.f32 %v4623_v26, %v607_v9  ;;  %v602_v30 = vadd.f32 %v601_v27, %v480_v0  ;;  %v4626_v31 = vpop.f32.mrf.mxu0  ;;  %4961 = vmatmul.mubr.msk.f32.gmra.mxu0 %vm397_vm1, %v5985_v57 }
  0xf3   : > { %v4612_v32 = vpop.f32.mrf.mxu1  ;;  %4947 = vmatmul.mubr.msk.f32.gmra.mxu1 %vm397_vm1, %v5991_v1  ;;  %4963 = vmatprep.mubr.msk.f32.mxu0 %vm397_vm1, %v5994_v4 }
  0xf4   : > { %v788_v33 = vadd.f32 %v749_v28, %v602_v30  ;;  %v617_v34 = vadd.f32 %v4612_v32, %v4598_v23  ;;  %v759_v35 = vpop.f32.mrf.mxu0  ;;  %4949 = vmatprep.mubr.msk.f32.mxu1 %vm397_vm1, %v5998_v8 }
  0xf5   : > { %v611_v37 = vpop.f32.mrf.mxu1 }
  0xf6   : > { %v791_v38 = vadd.f32 %v4626_v31, %v617_v34  ;;  %v612_v39 = vadd.f32 %v611_v37, %v490_v16  ;;  %v4629_v41 = vpop.f32.mrf.mxu0  ;;  %4964 = vmatmul.mubr.msk.f32.gmra.mxu0 %vm397_vm1, %v6007_v10 }
  0xf7   : > { %v4615_v43 = vpop.f32.mrf.mxu1  ;;  %4950 = vmatmul.mubr.msk.f32.gmra.mxu1 %vm397_vm1, %v6012_v11  ;;  %4966 = vmatprep.mubr.msk.f32.mxu0 %vm397_vm1, %v3427_v2 }
  0xf8   : > { %v790_v44 = vadd.f32 %v759_v35, %v612_v39  ;;  %v627_v45 = vadd.f32 %v4615_v43, %v4601_v14  ;;  %v769_v47 = vpop.f32.mrf.mxu0  ;;  %4952 = vmatprep.mubr.msk.f32.mxu1 %vm397_vm1, %v6052_v19 }
  0xf9   : > { %v621_v46 = vpop.f32.mrf.mxu1 }
  0xfa   : > { %v793_v48 = vadd.f32 %v4629_v41, %v627_v45  ;;  %v622_v49 = vadd.f32 %v621_v46, %v500_v3  ;;  %v4632_v50 = vpop.f32.mrf.mxu0  ;;  %4967 = vmatmul.mubr.msk.f32.gmra.mxu0 %vm397_vm1, %v5709_v21 }
  0xfb   : > { %v4618_v52 = vpop.f32.mrf.mxu1  ;;  %4953 = vmatmul.mubr.msk.f32.gmra.mxu1 %vm397_vm1, %v5706_v20 }
  0xfc   : > { %v792_v54 = vadd.f32 %v769_v47, %v622_v49  ;;  %v637_v56 = vadd.f32 %v4618_v52, %v4604_v24  ;;  %v779_v58 = vpop.f32.mrf.mxu0 }
  0xfd   : > { %v631_v59 = vpop.f32.mrf.mxu1 }
  0xfe   : > { %v795_v36 = vadd.f32 %v4632_v50, %v637_v56  ;;  %v632_v55 = vadd.f32 %v631_v59, %v510_v25  ;;  %v4651_v40 = vpop.f32.mrf.mxu0 }
  0xff   : > { %v4637_v42 = vpop.f32.mrf.mxu1 }
 0x100   : > { %v794_v51 = vadd.f32 %v779_v58, %v632_v55  ;;  %v907_v57 = vadd.f32 %v4637_v42, %v789_v29  ;;  %v988_v61 = vpop.f32.mrf.mxu0 }
 0x101   : > { %v867_v63 = vpop.f32.mrf.mxu1 }
 0x102   : > { %v1028_v1 = vadd.f32 %v4651_v40, %v907_v57  ;;  %v906_v4 = vadd.f32 %v867_v63, %v788_v33  ;;  %v4654_v6 = vpop.f32.mrf.mxu0 }
 0x103   : > { %v4640_v21 = vpop.f32.mrf.mxu1 }
 0x104   : > { %v1027_v7 = vadd.f32 %v988_v61, %v906_v4  ;;  %v909_v8 = vadd.f32 %v4640_v21, %v791_v38  ;;  %v998_v10 = vpop.f32.mrf.mxu0 }
 0x105   : > { %v877_v20 = vpop.f32.mrf.mxu1 }
 0x106   : > { %v1030_v11 = vadd.f32 %v4654_v6, %v909_v8  ;;  %v908_v12 = vadd.f32 %v877_v20, %v790_v44  ;;  %v4657_v13 = vpop.f32.mrf.mxu0 }
 0x107   : > { %v4643_v53 = vpop.f32.mrf.mxu1 }
 0x108   : > { %v1029_v15 = vadd.f32 %v998_v10, %v908_v12  ;;  %v911_v17 = vadd.f32 %v4643_v53, %v793_v48  ;;  %v1008_v18 = vpop.f32.mrf.mxu0 }
 0x109   : > { %v887_v19 = vpop.f32.mrf.mxu1 }
 0x10a   : > { %v1032_v60 = vadd.f32 %v4657_v13, %v911_v17  ;;  %v910_v62 = vadd.f32 %v887_v19, %v792_v54  ;;  %v4660_v5 = vpop.f32.mrf.mxu0 }
 0x10b   : > { %v4646_v14 = vpop.f32.mrf.mxu1 }
 0x10c   : > { %v1031_v0 = vadd.f32 %v1008_v18, %v910_v62  ;;  %v913_v2 = vadd.f32 %v4646_v14, %v795_v36  ;;  %v1018_v3 = vpop.f32.mrf.mxu0 }
 0x10d   : > { %v897_v23 = vpop.f32.mrf.mxu1 }
 0x10e   : > { %v1034_v24 = vadd.f32 %v4660_v5, %v913_v2  ;;  %v912_v16 = vadd.f32 %v897_v23, %v794_v51  ;;  %v4679_v25 = vpop.f32.mrf.mxu0 }
 0x10f   : > { %v4665_v26 = vpop.f32.mrf.mxu1 }
 0x110   : > { %v1033_v22 = vadd.f32 %v1018_v3, %v912_v16  ;;  %v1148_v9 = vadd.f32 %v4665_v26, %v1028_v1  ;;  %v1226_v28 = vpop.f32.mrf.mxu0 }
 0x111   : > { %v1108_v27 = vpop.f32.mrf.mxu1 }
 0x112   : > { %v1266_v29 = vadd.f32 %v4679_v25, %v1148_v9  ;;  %v1147_v30 = vadd.f32 %v1108_v27, %v1027_v7  ;;  %v4682_v31 = vpop.f32.mrf.mxu0 }
 0x113   : > { %v4668_v32 = vpop.f32.mrf.mxu1 }
 0x114   : > { %v1265_v33 = vadd.f32 %v1226_v28, %v1147_v30  ;;  %v1150_v34 = vadd.f32 %v4668_v32, %v1030_v11  ;;  %v1236_v35 = vpop.f32.mrf.mxu0 }
 0x115   : > { %v1118_v37 = vpop.f32.mrf.mxu1 }
 0x116   : > { %v1268_v38 = vadd.f32 %v4682_v31, %v1150_v34  ;;  %v1149_v39 = vadd.f32 %v1118_v37, %v1029_v15  ;;  %v4685_v41 = vpop.f32.mrf.mxu0 }
 0x117   : > { %v4671_v43 = vpop.f32.mrf.mxu1 }
 0x118   : > { %v1267_v44 = vadd.f32 %v1236_v35, %v1149_v39  ;;  %v1152_v45 = vadd.f32 %v4671_v43, %v1032_v60  ;;  %v1246_v47 = vpop.f32.mrf.mxu0 }
 0x119   : > { %v1128_v46 = vpop.f32.mrf.mxu1 }
 0x11a   : > { %v1270_v48 = vadd.f32 %v4685_v41, %v1152_v45  ;;  %v1151_v49 = vadd.f32 %v1128_v46, %v1031_v0  ;;  %v4688_v50 = vpop.f32.mrf.mxu0 }
 0x11b   : > { %v4674_v52 = vpop.f32.mrf.mxu1 }
 0x11c   : > { %v1269_v54 = vadd.f32 %v1246_v47, %v1151_v49  ;;  %v1154_v56 = vadd.f32 %v4674_v52, %v1034_v24  ;;  %v1256_v58 = vpop.f32.mrf.mxu0 }
 0x11d   : > { %v1138_v59 = vpop.f32.mrf.mxu1 }
 0x11e   : > { %v1272_v36 = vadd.f32 %v4688_v50, %v1154_v56  ;;  %v1153_v55 = vadd.f32 %v1138_v59, %v1033_v22  ;;  %v4707_v40 = vpop.f32.mrf.mxu0 }
 0x11f   : > { %v4693_v42 = vpop.f32.mrf.mxu1 }
 0x120   : > { %v1271_v51 = vadd.f32 %v1256_v58, %v1153_v55  ;;  %v1387_v57 = vadd.f32 %v4693_v42, %v1266_v29  ;;  %v1467_v61 = vpop.f32.mrf.mxu0 }
 0x121   : > { %v1347_v63 = vpop.f32.mrf.mxu1 }
 0x122   : > { %v1507_v1 = vadd.f32 %v4707_v40, %v1387_v57  ;;  %v1386_v4 = vadd.f32 %v1347_v63, %v1265_v33  ;;  %v4710_v6 = vpop.f32.mrf.mxu0 }
 0x123   : > { %v4696_v21 = vpop.f32.mrf.mxu1 }
 0x124   : > { %v1506_v7 = vadd.f32 %v1467_v61, %v1386_v4  ;;  %v1389_v8 = vadd.f32 %v4696_v21, %v1268_v38  ;;  %v1477_v10 = vpop.f32.mrf.mxu0 }
 0x125   : > { %v1357_v20 = vpop.f32.mrf.mxu1 }
 0x126   : > { %v1509_v11 = vadd.f32 %v4710_v6, %v1389_v8  ;;  %v1388_v12 = vadd.f32 %v1357_v20, %v1267_v44  ;;  %v4713_v13 = vpop.f32.mrf.mxu0 }
 0x127   : > { %v4699_v53 = vpop.f32.mrf.mxu1 }
 0x128   : > { %v1508_v15 = vadd.f32 %v1477_v10, %v1388_v12  ;;  %v1391_v17 = vadd.f32 %v4699_v53, %v1270_v48  ;;  %v1487_v18 = vpop.f32.mrf.mxu0 }
 0x129   : > { %v1367_v19 = vpop.f32.mrf.mxu1 }
 0x12a   : > { %v1511_v60 = vadd.f32 %v4713_v13, %v1391_v17  ;;  %v1390_v62 = vadd.f32 %v1367_v19, %v1269_v54  ;;  %v4716_v5 = vpop.f32.mrf.mxu0 }
 0x12b   : > { %v4702_v14 = vpop.f32.mrf.mxu1 }
 0x12c   : > { %v1510_v0 = vadd.f32 %v1487_v18, %v1390_v62  ;;  %v1393_v2 = vadd.f32 %v4702_v14, %v1272_v36  ;;  %v1497_v3 = vpop.f32.mrf.mxu0 }
 0x12d   : > { %v1377_v23 = vpop.f32.mrf.mxu1 }
 0x12e   : > { %v1513_v24 = vadd.f32 %v4716_v5, %v1393_v2  ;;  %v1392_v16 = vadd.f32 %v1377_v23, %v1271_v51  ;;  %v4735_v25 = vpop.f32.mrf.mxu0 }
 0x12f   : > { %v4721_v26 = vpop.f32.mrf.mxu1 }
 0x130   : > { %v1512_v22 = vadd.f32 %v1497_v3, %v1392_v16  ;;  %v1666_v9 = vadd.f32 %v4721_v26, %v1507_v1  ;;  %v1789_v28 = vpop.f32.mrf.mxu0 }
 0x131   : > { %v1626_v27 = vpop.f32.mrf.mxu1 }
 0x132   : > { %v1829_v29 = vadd.f32 %v4735_v25, %v1666_v9  ;;  %v1665_v30 = vadd.f32 %v1626_v27, %v1506_v7  ;;  %v4738_v31 = vpop.f32.mrf.mxu0 }
 0x133   : > { %v4724_v32 = vpop.f32.mrf.mxu1 }
 0x134   : > { %v1828_v33 = vadd.f32 %v1789_v28, %v1665_v30  ;;  %v1668_v34 = vadd.f32 %v4724_v32, %v1509_v11  ;;  %v1799_v35 = vpop.f32.mrf.mxu0 }
 0x135   : > { %v1636_v37 = vpop.f32.mrf.mxu1 }
 0x136   : > { %v1831_v38 = vadd.f32 %v4738_v31, %v1668_v34  ;;  %v1667_v39 = vadd.f32 %v1636_v37, %v1508_v15  ;;  %v4741_v41 = vpop.f32.mrf.mxu0 }
 0x137   : > { %v4727_v43 = vpop.f32.mrf.mxu1 }
 0x138   : > { %v1830_v44 = vadd.f32 %v1799_v35, %v1667_v39  ;;  %v1670_v45 = vadd.f32 %v4727_v43, %v1511_v60  ;;  %v1809_v47 = vpop.f32.mrf.mxu0 }
 0x139   : > { %v1646_v46 = vpop.f32.mrf.mxu1 }
 0x13a   : > { %v1833_v48 = vadd.f32 %v4741_v41, %v1670_v45  ;;  %v1669_v49 = vadd.f32 %v1646_v46, %v1510_v0  ;;  %v4744_v50 = vpop.f32.mrf.mxu0 }
 0x13b   : > { %v4730_v52 = vpop.f32.mrf.mxu1 }
 0x13c   : > { %v1832_v54 = vadd.f32 %v1809_v47, %v1669_v49  ;;  %v1672_v56 = vadd.f32 %v4730_v52, %v1513_v24  ;;  %v1819_v58 = vpop.f32.mrf.mxu0 }
 0x13d   : > { %v1656_v59 = vpop.f32.mrf.mxu1 }
 0x13e   : > { %v1835_v36 = vadd.f32 %v4744_v50, %v1672_v56  ;;  %v1671_v55 = vadd.f32 %v1656_v59, %v1512_v22  ;;  %v4763_v40 = vpop.f32.mrf.mxu0 }
 0x13f   : > { %v4749_v42 = vpop.f32.mrf.mxu1 }
 0x140   : > { %v1834_v51 = vadd.f32 %v1819_v58, %v1671_v55  ;;  %v1984_v57 = vadd.f32 %v4749_v42, %v1829_v29  ;;  %v2062_v61 = vpop.f32.mrf.mxu0 }
 0x141   : > { %v1944_v63 = vpop.f32.mrf.mxu1 }
 0x142   : > { %v2102_v1 = vadd.f32 %v4763_v40, %v1984_v57  ;;  %v1983_v4 = vadd.f32 %v1944_v63, %v1828_v33  ;;  %v4766_v6 = vpop.f32.mrf.mxu0 }
 0x143   : > { %v4752_v21 = vpop.f32.mrf.mxu1 }
 0x144   : > { %v2101_v7 = vadd.f32 %v2062_v61, %v1983_v4  ;;  %v1986_v8 = vadd.f32 %v4752_v21, %v1831_v38  ;;  %v2072_v10 = vpop.f32.mrf.mxu0 }
 0x145   : > { %v1954_v20 = vpop.f32.mrf.mxu1 }
 0x146   : > { %v2104_v11 = vadd.f32 %v4766_v6, %v1986_v8  ;;  %v1985_v12 = vadd.f32 %v1954_v20, %v1830_v44  ;;  %v4769_v13 = vpop.f32.mrf.mxu0 }
 0x147   : > { %v4755_v53 = vpop.f32.mrf.mxu1 }
 0x148   : > { %v2103_v15 = vadd.f32 %v2072_v10, %v1985_v12  ;;  %v1988_v17 = vadd.f32 %v4755_v53, %v1833_v48  ;;  %v2082_v18 = vpop.f32.mrf.mxu0 }
 0x149   : > { %v1964_v19 = vpop.f32.mrf.mxu1 }
 0x14a   : > { %v2106_v60 = vadd.f32 %v4769_v13, %v1988_v17  ;;  %v1987_v62 = vadd.f32 %v1964_v19, %v1832_v54  ;;  %v4772_v5 = vpop.f32.mrf.mxu0 }
 0x14b   : > { %v4758_v14 = vpop.f32.mrf.mxu1 }
 0x14c   : > { %v2105_v0 = vadd.f32 %v2082_v18, %v1987_v62  ;;  %v1990_v2 = vadd.f32 %v4758_v14, %v1835_v36  ;;  %v2092_v3 = vpop.f32.mrf.mxu0 }
 0x14d   : > { %v1974_v23 = vpop.f32.mrf.mxu1 }
 0x14e   : > { %v2108_v24 = vadd.f32 %v4772_v5, %v1990_v2  ;;  %v1989_v16 = vadd.f32 %v1974_v23, %v1834_v51  ;;  %v4791_v25 = vpop.f32.mrf.mxu0 }
 0x14f   : > { %v4777_v26 = vpop.f32.mrf.mxu1 }
 0x150   : > { %v2107_v22 = vadd.f32 %v2092_v3, %v1989_v16  ;;  %v2223_v9 = vadd.f32 %v4777_v26, %v2102_v1  ;;  %v2303_v28 = vpop.f32.mrf.mxu0 }
 0x151   : > { %v2183_v27 = vpop.f32.mrf.mxu1 }
 0x152   : > { %v6121_v29 = vadd.f32 %v4791_v25, %v2223_v9  ;;  %v2222_v30 = vadd.f32 %v2183_v27, %v2101_v7  ;;  %v4794_v31 = vpop.f32.mrf.mxu0 }
 0x153   : > { %v4780_v32 = vpop.f32.mrf.mxu1 }
 0x154   : > { %v6123_v33 = vadd.f32 %v2303_v28, %v2222_v30  ;;  %v2225_v34 = vadd.f32 %v4780_v32, %v2104_v11  ;;  %v2313_v35 = vpop.f32.mrf.mxu0 }
 0x155   : > { %v2193_v37 = vpop.f32.mrf.mxu1 }
 0x156   : > { %v6125_v38 = vadd.f32 %v4794_v31, %v2225_v34  ;;  %v2224_v39 = vadd.f32 %v2193_v37, %v2103_v15  ;;  %v4797_v41 = vpop.f32.mrf.mxu0 }
 0x157   : > { %v4783_v43 = vpop.f32.mrf.mxu1 }
 0x158   : > { %v6127_v44 = vadd.f32 %v2313_v35, %v2224_v39  ;;  %v2227_v45 = vadd.f32 %v4783_v43, %v2106_v60  ;;  %v2323_v47 = vpop.f32.mrf.mxu0 }
 0x159   : > { %v2203_v46 = vpop.f32.mrf.mxu1 }
 0x15a   : > { %v6129_v48 = vadd.f32 %v4797_v41, %v2227_v45  ;;  %v2226_v49 = vadd.f32 %v2203_v46, %v2105_v0  ;;  %v4800_v50 = vpop.f32.mrf.mxu0 }
 0x15b   : > { %v4786_v52 = vpop.f32.mrf.mxu1 }
 0x15c   : > { %v6131_v54 = vadd.f32 %v2323_v47, %v2226_v49  ;;  %v2229_v56 = vadd.f32 %v4786_v52, %v2108_v24  ;;  %v2333_v58 = vpop.f32.mrf.mxu0 }
 0x15d   : > { %v2213_v59 = vpop.f32.mrf.mxu1 }
 0x15e   : > { %v6133_v36 = vadd.f32 %v4800_v50, %v2229_v56  ;;  %v2228_v55 = vadd.f32 %v2213_v59, %v2107_v22  ;;  %v4819_v40 = vpop.f32.mrf.mxu0 }
 0x15f   : > { %v4805_v42 = vpop.f32.mrf.mxu1 }
 0x160   : > { %v6135_v51 = vadd.f32 %v2333_v58, %v2228_v55  ;;  %v2542_v57 = vpop.f32.mrf.mxu0  ;;  %v2461_v56 = vadd.f32 %v4805_v42, %v6121_v29 }
 0x161   : > { %v2421_v61 = vpop.f32.mrf.mxu1 }
 0x162   : > { %v6137_v63 = vpop.f32.mrf.mxu0  ;;  %v2460_v55 = vadd.f32 %v2421_v61, %v6123_v33 }
 0x163   : > { %v4808_v1 = vpop.f32.mrf.mxu1 }
 0x164   : > { %v6139_v4 = vpop.f32.mrf.mxu0 }
 0x165   : > { %v2431_v6 = vpop.f32.mrf.mxu1 }
 0x166   : > { %v6141_v21 = vpop.f32.mrf.mxu0  ;;  %v2462_v29 = vadd.f32 %v2431_v6, %v6127_v44 }
 0x167   : > { %v4811_v7 = vpop.f32.mrf.mxu1 }
 0x168   : > { %v6143_v8 = vpop.f32.mrf.mxu0 }
 0x169   : > { %v2441_v10 = vpop.f32.mrf.mxu1 }
 0x16a   : > { %v6145_v20 = vpop.f32.mrf.mxu0 }
 0x16b   : > { %v6147_v11 = vpop.f32.mrf.mxu1 }
 0x16c   : > { %v6149_v12 = vpop.f32.mrf.mxu0 }
 0x16d   : > { %v6151_v13 = vpop.f32.mrf.mxu1 }
 0x16e   : > { %v4847_v53 = vpop.f32.mrf.mxu0 }
 0x16f   : > { %v4833_v15 = vpop.f32.mrf.mxu1 }
 0x170   : > { %v2821_v17 = vpop.f32.mrf.mxu0 }
 0x171   : > { %v2662_v18 = vpop.f32.mrf.mxu1 }
 0x172   : > { %v6153_v19 = vpop.f32.mrf.mxu0 }
 0x173   : > { %v4836_v60 = vpop.f32.mrf.mxu1 }
 0x174   : > { %v6155_v62 = vpop.f32.mrf.mxu0 }
 0x175   : > { %v2672_v5 = vpop.f32.mrf.mxu1 }
 0x176   : > { %v6157_v14 = vpop.f32.mrf.mxu0 }
 0x177   : > { %v6159_v0 = vpop.f32.mrf.mxu1 }
 0x178   : > { %v6161_v2 = vpop.f32.mrf.mxu0 }
 0x179   : > { %v6163_v3 = vpop.f32.mrf.mxu1 }
 0x17a   : > { %v6165_v23 = vpop.f32.mrf.mxu0 }
 0x17b   : > { %v6167_v24 = vpop.f32.mrf.mxu1 }
 0x17c   : > { %v6169_v16 = vpop.f32.mrf.mxu0 }
 0x17d   : > { %6396 = vst [vmem:[#allocation5_spill] sm:$0xff] %v6169_v16  ;;  %v6171_v25 = vpop.f32.mrf.mxu1 }
 0x17e   : > { %v6173_v26 = vpop.f32.mrf.mxu0 }
 0x17f   : > { %v4861_v22 = vpop.f32.mrf.mxu1 }
 0x180   : > { %v6175_v9 = vpop.f32.mrf.mxu0 }
 0x181   : > { %v2984_v28 = vpop.f32.mrf.mxu1 }
 0x182   : > { %v6177_v27 = vpop.f32.mrf.mxu0 }
 0x183   : > { %v4864_v30 = vpop.f32.mrf.mxu1 }
 0x184   : > { %v6179_v31 = vpop.f32.mrf.mxu0 }
 0x185   : > { %v6181_v32 = vpop.f32.mrf.mxu1 }
 0x186   : > { %v6183_v34 = vpop.f32.mrf.mxu0 }
 0x187   : > { %6397 = vst [vmem:[#allocation6_spill] sm:$0xff] %v6183_v34  ;;  %v6185_v35 = vpop.f32.mrf.mxu1 }
 0x188   : > { %v6187_v37 = vpop.f32.mrf.mxu0 }
 0x189   : > { %6398 = vst [vmem:[#allocation7_spill] sm:$0xff] %v6187_v37  ;;  %v6189_v39 = vpop.f32.mrf.mxu1 }
 0x18a   : > { %v6191_v41 = vpop.f32.mrf.mxu0 }
 0x18b   : > { %6399 = vst [vmem:[#allocation8_spill] sm:$0xff] %v6191_v41  ;;  %v6193_v43 = vpop.f32.mrf.mxu1 }
 0x18c   : > { %6400 = vst [vmem:[#allocation9_spill] sm:$0xff] %v6193_v43  ;;  %v6195_v45 = vpop.f32.mrf.mxu0 }
 0x18d   : > { %6401 = vst [vmem:[#allocation10_spill] sm:$0xff] %v6195_v45  ;;  %v6197_v47 = vpop.f32.mrf.mxu1  ;;  %v2582_v45 = vadd.f32 %v4819_v40, %v2461_v56  ;;  %v2465_v40 = vadd.f32 %v4811_v7, %v6129_v48 }
 0x18e   : > { %6402 = vst [vmem:[#allocation11_spill] sm:$0xff] %v6197_v47  ;;  %v6199_v46 = vpop.f32.mrf.mxu0  ;;  %v2463_v47 = vadd.f32 %v4808_v1, %v6125_v38  ;;  %v2464_v38 = vadd.f32 %v2441_v10, %v6131_v54 }
 0x18f   : > { %v4889_v49 = vpop.f32.mrf.mxu1  ;;  %v2702_v42 = vadd.f32 %v4833_v15, %v2582_v45  ;;  %v2467_v15 = vadd.f32 %v6147_v11, %v6133_v36  ;;  %v2586_v48 = vadd.f32 %v6141_v21, %v2465_v40  ;;  %v6406_v40 = vld [vmem:[#allocation5_spill] sm:$0xff] }
 0x190   : > { %v6201_v50 = vpop.f32.mrf.mxu0  ;;  %v2584_v33 = vadd.f32 %v6137_v63, %v2463_v47  ;;  %v2585_v54 = vadd.f32 %v6143_v8, %v2464_v38 }
 0x191   : > { %6403 = vst [vmem:[#allocation12_spill] sm:$0xff] %v6201_v50  ;;  %v3257_v52 = vpop.f32.mrf.mxu1  ;;  %v2581_v50 = vadd.f32 %v2542_v57, %v2460_v55  ;;  %v2583_v57 = vadd.f32 %v6139_v4, %v2462_v29  ;;  %v2861_v56 = vadd.f32 %v4847_v53, %v2702_v42  ;;  %v2466_v4 = vadd.f32 %v6151_v13, %v6135_v51 }
 0x192   : > { %v6204_v58 = vpop.f32.mrf.mxu0  ;;  %v2704_v44 = vadd.f32 %v4836_v60, %v2584_v33  ;;  %v2588_v36 = vadd.f32 %v6145_v20, %v2467_v15  ;;  %v2706_v11 = vadd.f32 %v6159_v0, %v2586_v48 }
 0x193   : > { %6404 = vst [vmem:[#allocation13_spill] sm:$0xff] %v6204_v58  ;;  %v6206_v59 = vpop.f32.mrf.mxu1  ;;  %v2701_v61 = vadd.f32 %v2662_v18, %v2581_v50  ;;  %v2703_v18 = vadd.f32 %v2672_v5, %v2583_v57  ;;  %v3024_v47 = vadd.f32 %v4861_v22, %v2861_v56  ;;  %v2587_v51 = vadd.f32 %v6149_v12, %v2466_v4 }
 0x194   : > { %v6209_v41 = vpop.f32.mrf.mxu0  ;;  %v2863_v10 = vadd.f32 %v6153_v19, %v2704_v44  ;;  %v2708_v13 = vadd.f32 %v6167_v24, %v2588_v36 }
 0x195   : > { %6405 = vst [vmem:[#allocation14_spill] sm:$0xff] %v6209_v41  ;;  %v6211_v37 = vpop.f32.mrf.mxu1  ;;  %v2860_v63 = vadd.f32 %v2821_v17, %v2701_v61  ;;  %v2705_v17 = vadd.f32 %v6163_v3, %v2585_v54  ;;  %v2862_v22 = vadd.f32 %v6155_v62, %v2703_v18  ;;  %v3179_v21 = vadd.f32 %v6173_v26, %v3024_v47  ;;  %v6410_v18 = vld [vmem:[#allocation7_spill] sm:$0xff] }
 0x196   : > { %v6214_v34 = vpop.f32.mrf.mxu0  ;;  %v3026_v8 = vadd.f32 %v4864_v30, %v2863_v10  ;;  %v2865_v3 = vadd.f32 %v6157_v14, %v2706_v11  ;;  %v2707_v62 = vadd.f32 %v6171_v25, %v2587_v51  ;;  %v2867_v24 = vadd.f32 %v6165_v23, %v2708_v13  ;;  %v6411_v47 = vld [vmem:[#allocation11_spill] sm:$0xff]  ;;  %v6415_v13 = vld [vmem:[#allocation10_spill] sm:$0xff] }
 0x197   : > { %v6216_v43 = vpop.f32.mrf.mxu1  ;;  %v3023_v53 = vadd.f32 %v2984_v28, %v2860_v63  ;;  %v3025_v20 = vadd.f32 %v6181_v32, %v2862_v22  ;;  %v3297_v29 = vadd.f32 %v4889_v49, %v3179_v21  ;;  %v2864_v42 = vadd.f32 %v6161_v2, %v2705_v17 }
 0x198   : > { %v6219_v58 = vpop.f32.mrf.mxu0  ;;  %v3181_v30 = vadd.f32 %v6177_v27, %v3026_v8  ;;  %v2866_v38 = vadd.f32 %v6406_v40, %v2707_v62  ;;  %v6407_v27 = vld [vmem:[#allocation9_spill] sm:$0xff]  ;;  %v6408_v56 = vld [vmem:[#allocation12_spill] sm:$0xff] }
 0x199   : > { %v6221_v16 = vpop.f32.mrf.mxu1  ;;  %v3178_v28 = vadd.f32 %v6175_v9, %v3023_v53  ;;  %v3028_v9 = vadd.f32 %v6185_v35, %v2865_v3  ;;  %v3027_v32 = vadd.f32 %v6189_v39, %v2864_v42  ;;  %v3180_v61 = vadd.f32 %v6179_v31, %v3025_v20  ;;  %v6409_v39 = vld [vmem:[#allocation6_spill] sm:$0xff]  ;;  %v6413_v53 = vld [vmem:[#allocation8_spill] sm:$0xff] }
 0x19a   : > { %v6224_v41 = vpop.f32.mrf.mxu0  ;;  %v3418_v14 = vadd.f32 %v6199_v46, %v3297_v29  ;;  %v3299_v2 = vadd.f32 %v6206_v59, %v3181_v30  ;;  %v3029_v46 = vadd.f32 %v6411_v47, %v2866_v38  ;;  %v6412_v59 = vld [vmem:[#allocation13_spill] sm:$0xff] }
 0x19b   : > { %v6228_v1 = vpop.f32.mrf.mxu1  ;;  %v3296_v33 = vadd.f32 %v3257_v52, %v3178_v28  ;;  %v3030_v52 = vadd.f32 %v6407_v27, %v2867_v24  ;;  %v3298_v23 = vadd.f32 %v6211_v37, %v3180_v61  ;;  %v3183_v63 = vadd.f32 %v6409_v39, %v3028_v9 }
 0x19c   : > { %v6231_v6 = vpop.f32.mrf.mxu0  ;;  %v3182_v31 = vadd.f32 %v6410_v18, %v3027_v32  ;;  %v3420_v54 = vadd.f32 %v6412_v59, %v3299_v2  ;;  %v6414_v17 = vld [vmem:[#allocation14_spill] sm:$0xff]  ;;  %v3184_v28 = vadd.f32 %v6415_v13, %v3029_v46 }
 0x19d   : > { %v6235_v45 = vpop.f32.mrf.mxu1  ;;  %v3417_v44 = vadd.f32 %v6408_v56, %v3296_v33  ;;  %v3185_v36 = vadd.f32 %v6413_v53, %v3030_v52  ;;  %v3301_v11 = vadd.f32 %v6216_v43, %v3183_v63  ;;  %v3419_v22 = vadd.f32 %v6414_v17, %v3298_v23 }
 0x19e   : > { %v4931_v50 = vpop.f32.mrf.mxu0  ;;  %v3300_v37 = vadd.f32 %v6221_v16, %v3182_v31  ;;  %v3302_v30 = vadd.f32 %v6235_v45, %v3184_v28 }
 0x19f   : > { %v4917_v7 = vpop.f32.mrf.mxu1  ;;  %v3303_v20 = vadd.f32 %v6228_v1, %v3185_v36  ;;  %v3422_v43 = vadd.f32 %v6214_v34, %v3301_v11 }
 0x1a0   : > { %v3616_v60 = vpop.f32.mrf.mxu0  ;;  %v3538_v35 = vadd.f32 %v4917_v7, %v3418_v14  ;;  %v3421_v16 = vadd.f32 %v6219_v58, %v3300_v37  ;;  %v6292_v58 = vld [vmem:[%s6392_s4 + $0x1] ss:$0 sm:$0xff]  ;;  %v3423_v40 = vadd.f32 %v6231_v6, %v3302_v30 }
 0x1a1   : > { %v3498_v5 = vpop.f32.mrf.mxu1  ;;  %v3424_v24 = vadd.f32 %v6224_v41, %v3303_v20 }
 0x1a2   : > { %v4934_v55 = vpop.f32.mrf.mxu0  ;;  %v3537_v4 = vadd.f32 %v3498_v5, %v3417_v44  ;;  %v3656_v21 = vadd.f32 %v4931_v50, %v3538_v35  ;;  %v6286_v50 = vld [vmem:[%s6392_s4] ss:$0 sm:$0xff] }
 0x1a3   : > { %v4920_v19 = vpop.f32.mrf.mxu1 }
 0x1a4   : > { %v3626_v0 = vpop.f32.mrf.mxu0  ;;  %v3540_v8 = vadd.f32 %v4920_v19, %v3420_v54  ;;  %v3655_v29 = vadd.f32 %v3616_v60, %v3537_v4 }
 0x1a5   : > { %v3508_v26 = vpop.f32.mrf.mxu1 }
 0x1a6   : > { %v6255_v12 = vpop.f32.mrf.mxu0  ;;  %v3539_v3 = vadd.f32 %v3508_v26, %v3419_v22  ;;  %v3658_v1 = vadd.f32 %v4934_v55, %v3540_v8 }
 0x1a7   : > { %v4923_v49 = vpop.f32.mrf.mxu1 }
 0x1a8   : > { %v3636_v25 = vpop.f32.mrf.mxu0  ;;  %v3542_v9 = vadd.f32 %v4923_v49, %v3422_v43  ;;  %v3657_v32 = vadd.f32 %v3626_v0, %v3539_v3 }
 0x1a9   : > { %v3518_v57 = vpop.f32.mrf.mxu1 }
 0x1aa   : > { %v4940_v15 = vpop.f32.mrf.mxu0  ;;  %v3541_v34 = vadd.f32 %v3518_v57, %v3421_v16  ;;  %v3660_v0 = vadd.f32 %v6255_v12, %v3542_v9 }
 0x1ab   : > { %v4926_v48 = vpop.f32.mrf.mxu1 }
 0x1ac   : > { %v6271_v10 = vpop.f32.mrf.mxu0  ;;  %v3544_v38 = vadd.f32 %v4926_v48, %v3424_v24  ;;  %v3659_v44 = vadd.f32 %v3636_v25, %v3541_v34 }
 0x1ad   : > { %v3528_v7 = vpop.f32.mrf.mxu1 }
 0x1ae   : > { %v4959_v51 = vpop.f32.mrf.mxu0  ;;  %v3543_v23 = vadd.f32 %v3528_v7, %v3423_v40  ;;  %v3662_v47 = vadd.f32 %v4940_v15, %v3544_v38 }
 0x1af   : > { %v4945_v5 = vpop.f32.mrf.mxu1 }
 0x1b0   : > { %v3777_v42 = vadd.f32 %v4945_v5, %v3656_v21  ;;  %v3857_v62 = vpop.f32.mrf.mxu0  ;;  %v3661_v4 = vadd.f32 %v6271_v10, %v3543_v23 }
 0x1b1   : > { %v3737_v19 = vpop.f32.mrf.mxu1 }
 0x1b2   : > { %v3897_v33 = vadd.f32 %v4959_v51, %v3777_v42  ;;  %v3776_v60 = vadd.f32 %v3737_v19, %v3655_v29  ;;  %v4962_v26 = vpop.f32.mrf.mxu0 }
 0x1b3   : > { %v4948_v45 = vpop.f32.mrf.mxu1 }
 0x1b4   : > { %v3911_v61 = vmul.f32 %v6286_v50, %v3897_v33  ;;  %v3896_v14 = vadd.f32 %v3857_v62, %v3776_v60  ;;  %v3779_v55 = vadd.f32 %v4948_v45, %v3658_v1  ;;  %v3867_v2 = vpop.f32.mrf.mxu0 }
 0x1b5   : > { %v3747_v41 = vpop.f32.mrf.mxu1 }
 0x1b6   : > { %v3923_v49 = vadd.f32 %v6292_v58, %v3911_v61  ;;  %v3910_v27 = vmul.f32 %v6286_v50, %v3896_v14  ;;  %v3899_v52 = vadd.f32 %v4962_v26, %v3779_v55  ;;  %v3778_v57 = vadd.f32 %v3747_v41, %v3657_v32  ;;  %v4965_v56 = vpop.f32.mrf.mxu0 }
 0x1b7   : > { %v4951_v35 = vpop.f32.mrf.mxu1 }
 0x1b8   : > { %v3931_v39 = vmax.f32 %v3923_v49, 0.0  ;;  %v3922_v63 = vadd.f32 %v6292_v58, %v3910_v27  ;;  %v3913_v18 = vmul.f32 %v6286_v50, %v3899_v52  ;;  %v3898_v6 = vadd.f32 %v3867_v2, %v3778_v57  ;;  %v3877_v31 = vpop.f32.mrf.mxu0 }
 0x1b9   : > { %v3781_v46 = vadd.f32 %v4951_v35, %v3660_v0  ;;  %v3757_v48 = vpop.f32.mrf.mxu1 }
 0x1ba   : > { %3939 = vst [vmem:[%s6303_s30 + $0x8] sm:$0xff] %v3931_v39  ;;  %v3930_v12 = vmax.f32 %v3922_v63, 0.0  ;;  %v3925_v25 = vadd.f32 %v6292_v58, %v3913_v18  ;;  %v3912_v59 = vmul.f32 %v6286_v50, %v3898_v6  ;;  %v3780_v54 = vadd.f32 %v3757_v48, %v3659_v44  ;;  %v4968_v36 = vpop.f32.mrf.mxu0 }
 0x1bb   : > { %v3901_v53 = vadd.f32 %v4965_v56, %v3781_v46  ;;  %v4954_v15 = vpop.f32.mrf.mxu1 }
 0x1bc   : > { %3938 = vst [vmem:[%s6303_s30] sm:$0xff] %v3930_v12  ;;  %v3933_v11 = vmax.f32 %v3925_v25, 0.0  ;;  %v3924_v37 = vadd.f32 %v6292_v58, %v3912_v59  ;;  %v3900_v7 = vadd.f32 %v3877_v31, %v3780_v54  ;;  %v3783_v17 = vadd.f32 %v4954_v15, %v3662_v47  ;;  %v3887_v20 = vpop.f32.mrf.mxu0 }
 0x1bd   : > { %v3915_v22 = vmul.f32 %v6286_v50, %v3901_v53  ;;  %v3767_v21 = vpop.f32.mrf.mxu1 }
 0x1be   : > { %3941 = vst [vmem:[%s6303_s30 + $0x18] sm:$0xff] %v3933_v11  ;;  %v3932_v8 = vmax.f32 %v3924_v37, 0.0  ;;  %v3914_v10 = vmul.f32 %v6286_v50, %v3900_v7  ;;  %v3903_v51 = vadd.f32 %v4968_v36, %v3783_v17  ;;  %v3782_v13 = vadd.f32 %v3767_v21, %v3661_v4 }
 0x1bf   : > { %v3927_v28 = vadd.f32 %v6292_v58, %v3915_v22 }
 0x1c0   : > { %3940 = vst [vmem:[%s6303_s30 + $0x10] sm:$0xff] %v3932_v8  ;;  %v3926_v5 = vadd.f32 %v6292_v58, %v3914_v10  ;;  %v3917_v29 = vmul.f32 %v6286_v50, %v3903_v51  ;;  %v3902_v3 = vadd.f32 %v3887_v20, %v3782_v13 }
 0x1c1   : > { %v3935_v42 = vmax.f32 %v3927_v28, 0.0 }
 0x1c2   : > { %v3934_v62 = vmax.f32 %v3926_v5, 0.0  ;;  %v3929_v43 = vadd.f32 %v6292_v58, %v3917_v29  ;;  %v3916_v16 = vmul.f32 %v6286_v50, %v3902_v3 }
 0x1c3   : > { %3943 = vst [vmem:[%s6303_s30 + $0x28] sm:$0xff] %v3935_v42 }
 0x1c4   : > { %3942 = vst [vmem:[%s6303_s30 + $0x20] sm:$0xff] %v3934_v62  ;;  %v3937_v30 = vmax.f32 %v3929_v43, 0.0  ;;  %v3928_v19 = vadd.f32 %v6292_v58, %v3916_v16 }
 0x1c6   : > { %3945 = vst [vmem:[%s6303_s30 + $0x38] sm:$0xff] %v3937_v30  ;;  %v3936_v1 = vmax.f32 %v3928_v19, 0.0 }
 0x1c8   : > { %3944 = vst [vmem:[%s6303_s30 + $0x30] sm:$0xff] %v3936_v1 }
 0x1c9   : > { %5061 = shalt.err (!%p5058_p10)
}
 0x1ca   : > { %s5062_s9 = scalar_lea.hbm %s6329_s12, 1024  ;;  %s5066_s10 = scalar_lea.hbm %s6393_s5, 16384 }
 0x1cb   : > { %p5063_p11 = scmp.ne.s32.totalorder %s6329_s12, %s5062_s9  ;;  %p5067_p0 = scmp.lt.s32.totalorder %s6329_s12, %s6393_s5 }
 0x1cc   : > { %p5068_p1 = scmp.lt.s32.totalorder %s5066_s10, %s5062_s9 }
 0x1cd   : > { %p5064_p12 = pnand %p5063_p11, %p5226_p3 }
 0x1ce   : > { %p5069_p2 = por %p5068_p1, %p5067_p0 }
 0x1cf   : > { %p5065_p13 = pneg %p5064_p12 }
 0x1d1   : > { %p5070_p4 = pnand %p5069_p2, %p5065_p13 }
 0x1d3   : > { %5073 = shalt.err (!%p5070_p4)
}
 0x1d4   : > { %s5143_s17 = smov 128   ;;  %s5144_s15 = smov 8  }
 0x1d5   : > { %4975 = dma.vmem_to_hbm [thread:$0]  (%p5226_p3), %s6331_s22, 1024, %s6329_s12, %s6337_s13, %s5143_s17, %s5143_s17, %s5144_s15  }
 0x1d6 PF: > { %p4981_p5 = scmp.ge.s32.totalorder %s5140_s25, 2  ;;  %s3977_s16 = sand.u32 1, %s5112_s18  }
 0x1d7   : > { %s3978_s26 = scalar_lea.sflag [#allocation3], %s3977_s16 }
 0x1d8   : > { %p4978_p6 = pnand %p4981_p5, %p5235_p8 }
 0x1da   : > { %p4979_p7 = pneg %p4978_p6 }
 0x1dc   : > { %5107 = dma.done.wait (%p4979_p7), %s3978_s26, 1024  }
 0x1dd   : > { %5109 = vsyncadd (%p4979_p7), %s3978_s26, 4294966272  ;;  %s18_s25 = sadd.s32 1, %s5140_s25   ;;  %s6416_s18 = smov %s5116_s19 }
 0x1de   : > { %p15_p9 = scmp.ge.s32.totalorder %s18_s25, 18   ;;  %s6417_s19 = smov %s5120_s20 }
 0x1df   : > { %s6418_s20 = smov %s5244_s11  ;;  %s6419_s21 = smov %s5132_s23 }
 0x1e0   : > { %s6420_s22 = smov %s5136_s24  ;;  %s6421_s23 = smov %s6424_s28 }
 0x1e1   : > { %s6422_s24 = smov %s6428_s29  ;;  %17 = sbr.rel (!%p15_p9) target bundleno = 5 (0x5), region = 107 }
 0x1e6   :  { %3983 = vsyncpa [#allocation3], 1 }
 0x1e7   :  { %3985 = vsyncpa [#allocation3 + $0x1], 1 }

</bundles_post_ra>
